<compile_context>
chip_gen: v7x
topology: tpu7x:2x2x1
jax: 0.10.0
libtpu: 0.0.40
codegen_flags: <defaults>
</compile_context>

<pallas_src>
import jax
import jax.numpy as jnp
import numpy as np
from jax.experimental import pallas as pl
from jax.experimental.pallas import tpu as pltpu


def _round_up(x, m):
    return (x + m - 1) // m * m


def _bottleneck_kernel(x_ref, w1_ref, b1_ref, w2_ref, b2_ref, w3_ref, wsc_ref, bf_ref,
                       out_ref, h1_ref):
    t = pl.program_id(1)
    nt = pl.num_programs(1)
    TH, W, _ = out_ref.shape            # row tile, width, Cout (lane-padded)
    Cm = h1_ref.shape[-1]               # Cmid (lane-padded)
    cdt = x_ref.dtype                   # matmul input dtype (bf16 or f32)

    # ---- conv1: 1x1 (BN folded into weights) + bias + ReLU over the (TH+2)-row slab ----
    xh = x_ref[...]                                                   # (TH+2, W, Cin_p)
    x2d = xh.reshape((TH + 2) * W, xh.shape[-1])
    h1 = jnp.dot(x2d, w1_ref[...], preferred_element_type=jnp.float32)
    h1 = jnp.maximum(h1 + b1_ref[...], 0.0)                           # f32 epilogue

    # ---- stage into the W-padded slab; zero only the 1-pixel halo ----
    h1_ref[:, 1:W + 1, :] = h1.reshape(TH + 2, W, Cm).astype(h1_ref.dtype)
    zcol = jnp.zeros((TH + 2, 1, Cm), h1_ref.dtype)
    h1_ref[:, 0:1, :] = zcol                                          # left  W padding
    h1_ref[:, W + 1:W + 2, :] = zcol                                  # right W padding

    zrow = jnp.zeros((1, W + 2, Cm), h1_ref.dtype)

    @pl.when(t == 0)                     # top halo row lies outside the image
    def _():
        h1_ref[0:1, :, :] = zrow

    @pl.when(t == nt - 1)                # bottom halo row lies outside the image
    def _():
        h1_ref[TH + 1:TH + 2, :, :] = zrow

    # ---- conv2: 3x3 as a single im2col matmul (K = 9*Cmid) + bias + ReLU ----
    taps = [h1_ref[dy:dy + TH, dx:dx + W, :] for dy in range(3) for dx in range(3)]
    im2col = jnp.concatenate(taps, axis=-1).reshape(TH * W, 9 * Cm)
    h2 = jnp.dot(im2col, w2_ref[...], preferred_element_type=jnp.float32)
    h2 = jnp.maximum(h2 + b2_ref[...], 0.0).astype(cdt)

    # ---- conv3 (1x1) + projection shortcut fused: two dots, one accumulator, one bias ----
    xc = xh[1:TH + 1].reshape(TH * W, xh.shape[-1])                   # center rows of x
    y = jnp.dot(h2, w3_ref[...], preferred_element_type=jnp.float32)
    y = y + jnp.dot(xc, wsc_ref[...], preferred_element_type=jnp.float32)
    y = jnp.maximum(y + bf_ref[...], 0.0)                             # residual ReLU
    out_ref[...] = y.reshape(TH, W, -1).astype(out_ref.dtype)


def bottleneck_forward(x_nhwc, params, *, row_tile=8, use_bf16=True,
                       vmem_limit_bytes=32 * 1024 * 1024):
    """Fused RT-DETR ResNet bottleneck (stride=1, projection shortcut), NHWC input."""
    N, H, W, Cin = x_nhwc.shape
    Cmid = params["w1"].shape[1]
    Cout = params["w3"].shape[1]
    cdt = jnp.bfloat16 if use_bf16 else jnp.float32
    f32 = jnp.float32

    LANE = 128
    Cin_p, Cmid_p, Cout_p = (_round_up(c, LANE) for c in (Cin, Cmid, Cout))

    # Largest divisor of H that is <= row_tile; keeps the per-step working set small
    # enough for v7x's 64 MiB VMEM at production feature-map sizes.
    th = max(1, min(row_tile, H))
    while H % th:
        th -= 1
    num_t = H // th

    def pad2(w, r, c):
        return jnp.pad(w.astype(f32), ((0, r - w.shape[0]), (0, c - w.shape[1])))

    s1, b1 = params["s1"].reshape(-1), params["b1"].reshape(-1)
    s2, b2 = params["s2"].reshape(-1), params["b2"].reshape(-1)
    s3, b3 = params["s3"].reshape(-1), params["b3"].reshape(-1)
    ssc, bsc = params["ssc"].reshape(-1), params["bsc"].reshape(-1)

    # Fold BN scales into conv weights; zero-pad channel dims to multiples of 128.
    w1f = pad2(params["w1"] * s1[None, :], Cin_p, Cmid_p)
    w3f = pad2(params["w3"] * s3[None, :], Cmid_p, Cout_p)
    wscf = pad2(params["wsc"] * ssc[None, :], Cin_p, Cout_p)
    w2f = params["w2"] * s2[None, None, None, :]                      # (3,3,Cmid,Cmid) HWIO
    w2f = jnp.pad(w2f, ((0, 0), (0, 0), (0, Cmid_p - Cmid), (0, Cmid_p - Cmid)))
    w2r = w2f.reshape(9 * Cmid_p, Cmid_p)                             # tap-major im2col layout

    b1p = jnp.pad(b1, (0, Cmid_p - Cmid)).reshape(1, Cmid_p).astype(f32)
    b2p = jnp.pad(b2, (0, Cmid_p - Cmid)).reshape(1, Cmid_p).astype(f32)
    bfuse = jnp.pad(b3 + bsc, (0, Cout_p - Cout)).reshape(1, Cout_p).astype(f32)

    # Overlapped, row-tiled input with a 1-row halo on each side (zeros outside the image)
    # and lane-padded channels: (N, num_t, th+2, W, Cin_p).
    # TODO(synk): an Element-indexed halo BlockSpec (or manual halo DMA) would avoid
    #             materializing this overlapped copy in HBM.
    xp = jnp.pad(x_nhwc, ((0, 0), (1, 1), (0, 0), (0, Cin_p - Cin)))
    row_idx = jnp.arange(num_t)[:, None] * th + jnp.arange(th + 2)[None, :]
    x_tiled = jnp.take(xp, row_idx, axis=1).astype(cdt)

    w1f, w2r, w3f, wscf = (w.astype(cdt) for w in (w1f, w2r, w3f, wscf))

    def wspec(shape):
        return pl.BlockSpec(shape, lambda n, t: (0, 0))               # resident weights

    out_padded = pl.pallas_call(
        _bottleneck_kernel,
        out_shape=jax.ShapeDtypeStruct((N, H, W, Cout_p), jnp.float32),
        grid=(N, num_t),
        in_specs=[
            pl.BlockSpec((None, None, th + 2, W, Cin_p), lambda n, t: (n, t, 0, 0, 0)),
            wspec((Cin_p, Cmid_p)),        # conv1 weight (BN folded)
            wspec((1, Cmid_p)),            # conv1 bias
            wspec((9 * Cmid_p, Cmid_p)),   # conv2 weight, im2col layout
            wspec((1, Cmid_p)),            # conv2 bias
            wspec((Cmid_p, Cout_p)),       # conv3 weight
            wspec((Cin_p, Cout_p)),        # shortcut weight
            wspec((1, Cout_p)),            # fused bias (b3 + b_shortcut)
        ],
        out_specs=pl.BlockSpec((None, th, W, Cout_p), lambda n, t: (n, t, 0, 0)),
        scratch_shapes=[pltpu.VMEM((th + 2, W + 2, Cmid_p), cdt)],
        compiler_params=pltpu.CompilerParams(
            dimension_semantics=("parallel", "parallel"),
            vmem_limit_bytes=vmem_limit_bytes,
        ),
    )(x_tiled, w1f, b1p, w2r, b2p, w3f, wscf, bfuse)

    return out_padded[..., :Cout]


def make_params(key, cin, cout, reduction=4, eps=1e-5):
    """Deterministic synthetic parameters; BatchNorm expressed as per-channel scale/bias."""
    cmid = cout // reduction
    ks = jax.random.split(key, 8)

    def bn(k, c):
        kg, kb, km, kv = jax.random.split(k, 4)
        gamma = 1.0 + 0.1 * jax.random.normal(kg, (c,), jnp.float32)
        beta = 0.1 * jax.random.normal(kb, (c,), jnp.float32)
        mean = 0.1 * jax.random.normal(km, (c,), jnp.float32)
        var = jax.random.uniform(kv, (c,), jnp.float32, 0.5, 1.5)
        scale = gamma / jnp.sqrt(var + eps)
        bias = beta - mean * scale
        return scale.reshape(1, c), bias.reshape(1, c)

    w1 = 0.1 * jax.random.normal(ks[0], (cin, cmid), jnp.float32)         # 1x1
    w2 = 0.1 * jax.random.normal(ks[1], (3, 3, cmid, cmid), jnp.float32)  # 3x3 HWIO
    w3 = 0.1 * jax.random.normal(ks[2], (cmid, cout), jnp.float32)        # 1x1
    wsc = 0.1 * jax.random.normal(ks[3], (cin, cout), jnp.float32)        # shortcut 1x1
    s1, b1 = bn(ks[4], cmid)
    s2, b2 = bn(ks[5], cmid)
    s3, b3 = bn(ks[6], cout)
    ssc, bsc = bn(ks[7], cout)
    return dict(w1=w1, s1=s1, b1=b1, w2=w2, s2=s2, b2=b2,
                w3=w3, s3=s3, b3=b3, wsc=wsc, ssc=ssc, bsc=bsc)


def ref_forward(x_nhwc, p):
    """Pure-JAX reference (lax.conv) for correctness checking."""
    dn = ("NHWC", "HWIO", "NHWC")

    def conv1x1(x, w):
        return jax.lax.conv_general_dilated(x, w.reshape(1, 1, *w.shape),
                                            (1, 1), "SAME", dimension_numbers=dn)

    def conv3x3(x, w):
        return jax.lax.conv_general_dilated(x, w, (1, 1), "SAME",
                                            dimension_numbers=dn)

    h = jnp.maximum(conv1x1(x_nhwc, p["w1"]) * p["s1"] + p["b1"], 0.0)
    h = jnp.maximum(conv3x3(h, p["w2"]) * p["s2"] + p["b2"], 0.0)
    y = conv1x1(h, p["w3"]) * p["s3"] + p["b3"]
    r = conv1x1(x_nhwc, p["wsc"]) * p["ssc"] + p["bsc"]
    return jnp.maximum(y + r, 0.0)


if __name__ == "__main__":
    key = jax.random.PRNGKey(0)
    kx, kp = jax.random.split(key)

    # PyTorch-style NCHW input: batch=2, in_ch=32, 16x16 spatial, out_ch=64 (projection shortcut).
    N, Cin, H, W = 2, 32, 16, 16
    Cout = 64
    x_nchw = jax.random.normal(kx, (N, Cin, H, W), jnp.float32)
    x_nhwc = jnp.transpose(x_nchw, (0, 2, 3, 1))
    params = make_params(kp, Cin, Cout)

    ref = ref_forward(x_nhwc, params)

    # f32 MXU path: tight correctness check against the lax.conv reference.
    out_f32 = jax.block_until_ready(bottleneck_forward(x_nhwc, params, use_bf16=False))
    np.testing.assert_allclose(np.asarray(out_f32), np.asarray(ref), atol=5e-4, rtol=5e-4)

    # bf16 MXU path (v6e/v7x fast path; f32 accumulation + f32 epilogues): looser tolerance.
    out_bf16 = jax.block_until_ready(bottleneck_forward(x_nhwc, params, use_bf16=True))
    np.testing.assert_allclose(np.asarray(out_bf16), np.asarray(ref), atol=5e-2, rtol=5e-2)

    print("KERNEL_OK")
</pallas_src>

<mosaic_0001>
module attributes {stable_mosaic.version = 11 : i64} {
  func.func @_bottleneck_kernel(%arg0: i32, %arg1: i32, %arg2: memref<1x1x10x16x128xf32, #tpu.memory_space<vmem>>, %arg3: memref<128x128xf32, #tpu.memory_space<vmem>>, %arg4: memref<1x128xf32, #tpu.memory_space<vmem>>, %arg5: memref<1152x128xf32, #tpu.memory_space<vmem>>, %arg6: memref<1x128xf32, #tpu.memory_space<vmem>>, %arg7: memref<128x128xf32, #tpu.memory_space<vmem>>, %arg8: memref<128x128xf32, #tpu.memory_space<vmem>>, %arg9: memref<1x128xf32, #tpu.memory_space<vmem>>, %arg10: memref<1x8x16x128xf32, #tpu.memory_space<vmem>>, %arg11: memref<10x18x128xf32, #tpu.memory_space<vmem>>) attributes {dimension_semantics = [#tpu.dimension_semantics<parallel>, #tpu.dimension_semantics<parallel>], iteration_bounds = array<i64: 2, 2>, scalar_prefetch = 0 : i64, scratch_operands = 1 : i64, tpu.core_type = #tpu.core_type<tc>, window_params = [{transform_indices = @transform_0, window_bounds = array<i64: 1, 1, 10, 16, 128>}, {pipeline_mode = #tpu.pipeline_mode<synchronous>, transform_indices = @transform_1, window_bounds = array<i64: 128, 128>}, {pipeline_mode = #tpu.pipeline_mode<synchronous>, transform_indices = @transform_2, window_bounds = array<i64: 1, 128>}, {pipeline_mode = #tpu.pipeline_mode<synchronous>, transform_indices = @transform_3, window_bounds = array<i64: 1152, 128>}, {pipeline_mode = #tpu.pipeline_mode<synchronous>, transform_indices = @transform_4, window_bounds = array<i64: 1, 128>}, {pipeline_mode = #tpu.pipeline_mode<synchronous>, transform_indices = @transform_5, window_bounds = array<i64: 128, 128>}, {pipeline_mode = #tpu.pipeline_mode<synchronous>, transform_indices = @transform_6, window_bounds = array<i64: 128, 128>}, {pipeline_mode = #tpu.pipeline_mode<synchronous>, transform_indices = @transform_7, window_bounds = array<i64: 1, 128>}, {transform_indices = @transform_8, window_bounds = array<i64: 1, 8, 16, 128>}]} {
    %c0 = arith.constant 0 : index
    %c0_0 = arith.constant 0 : index
    %c0_1 = arith.constant 0 : index
    %c0_2 = arith.constant 0 : index
    %c0_3 = arith.constant 0 : index
    %0 = vector.load %arg2[%c0, %c0_0, %c0_1, %c0_2, %c0_3] : memref<1x1x10x16x128xf32, #tpu.memory_space<vmem>>, vector<1x1x10x16x128xf32>
    %1 = vector.shape_cast %0 : vector<1x1x10x16x128xf32> to vector<10x16x128xf32>
    %2 = vector.shape_cast %1 : vector<10x16x128xf32> to vector<160x128xf32>
    %c0_4 = arith.constant 0 : index
    %c0_5 = arith.constant 0 : index
    %3 = vector.load %arg3[%c0_4, %c0_5] : memref<128x128xf32, #tpu.memory_space<vmem>>, vector<128x128xf32>
    %cst = arith.constant dense<0.000000e+00> : vector<160x128xf32>
    %4 = tpu.matmul %2, %3, %cst {dimension_numbers = #tpu.dot_dimension_numbers<[1], [0], [0], [1], [0, 0, 1, 1], [], []>} : vector<160x128xf32>, vector<128x128xf32>, vector<160x128xf32> -> vector<160x128xf32>
    %c0_6 = arith.constant 0 : index
    %c0_7 = arith.constant 0 : index
    %5 = vector.load %arg4[%c0_6, %c0_7] : memref<1x128xf32, #tpu.memory_space<vmem>>, vector<1x128xf32>
    %6 = vector.broadcast %5 : vector<1x128xf32> to vector<160x128xf32>
    %7 = arith.addf %4, %6 : vector<160x128xf32>
    %cst_8 = arith.constant 0.000000e+00 : f32
    %8 = vector.broadcast %cst_8 : f32 to vector<160x128xf32>
    %9 = arith.maximumf %7, %8 : vector<160x128xf32>
    %10 = vector.shape_cast %9 : vector<160x128xf32> to vector<10x16x128xf32>
    %c0_9 = arith.constant 0 : index
    %c1 = arith.constant 1 : index
    %c0_10 = arith.constant 0 : index
    %11 = vector.load %arg11[%c0_9, %c1, %c0_10] : memref<10x18x128xf32, #tpu.memory_space<vmem>>, vector<10x16x128xf32>
    tpu.vector_store %arg11[%c0_9, %c1, %c0_10], %10 {strides = array<i32>} : memref<10x18x128xf32, #tpu.memory_space<vmem>>, vector<10x16x128xf32>,
    %cst_11 = arith.constant 0.000000e+00 : f32
    %12 = vector.broadcast %cst_11 : f32 to vector<10x1x128xf32>
    %c0_12 = arith.constant 0 : index
    %c0_13 = arith.constant 0 : index
    %c0_14 = arith.constant 0 : index
    %13 = vector.load %arg11[%c0_12, %c0_13, %c0_14] : memref<10x18x128xf32, #tpu.memory_space<vmem>>, vector<10x1x128xf32>
    tpu.vector_store %arg11[%c0_12, %c0_13, %c0_14], %12 {strides = array<i32>} : memref<10x18x128xf32, #tpu.memory_space<vmem>>, vector<10x1x128xf32>,
    %c0_15 = arith.constant 0 : index
    %c17 = arith.constant 17 : index
    %c0_16 = arith.constant 0 : index
    %14 = vector.load %arg11[%c0_15, %c17, %c0_16] : memref<10x18x128xf32, #tpu.memory_space<vmem>>, vector<10x1x128xf32>
    tpu.vector_store %arg11[%c0_15, %c17, %c0_16], %12 {strides = array<i32>} : memref<10x18x128xf32, #tpu.memory_space<vmem>>, vector<10x1x128xf32>,
    %cst_17 = arith.constant 0.000000e+00 : f32
    %15 = vector.broadcast %cst_17 : f32 to vector<1x18x128xf32>
    %c0_i32 = arith.constant 0 : i32
    %16 = arith.cmpi eq, %arg1, %c0_i32 : i32
    %17 = arith.extui %16 : i1 to i32
    %c0_i32_18 = arith.constant 0 : i32
    %18 = arith.cmpi ne, %17, %c0_i32_18 : i32
    scf.if %18 {
      %c0_65 = arith.constant 0 : index
      %c0_66 = arith.constant 0 : index
      %c0_67 = arith.constant 0 : index
      %56 = vector.load %arg11[%c0_65, %c0_66, %c0_67] : memref<10x18x128xf32, #tpu.memory_space<vmem>>, vector<1x18x128xf32>
      tpu.vector_store %arg11[%c0_65, %c0_66, %c0_67], %15 {strides = array<i32>} : memref<10x18x128xf32, #tpu.memory_space<vmem>>, vector<1x18x128xf32>,
    } else {
    }
    %c1_i32 = arith.constant 1 : i32
    %19 = arith.cmpi eq, %arg1, %c1_i32 : i32
    %20 = arith.extui %19 : i1 to i32
    %c0_i32_19 = arith.constant 0 : i32
    %21 = arith.cmpi ne, %20, %c0_i32_19 : i32
    scf.if %21 {
      %c9 = arith.constant 9 : index
      %c0_65 = arith.constant 0 : index
      %c0_66 = arith.constant 0 : index
      %56 = vector.load %arg11[%c9, %c0_65, %c0_66] : memref<10x18x128xf32, #tpu.memory_space<vmem>>, vector<1x18x128xf32>
      tpu.vector_store %arg11[%c9, %c0_65, %c0_66], %15 {strides = array<i32>} : memref<10x18x128xf32, #tpu.memory_space<vmem>>, vector<1x18x128xf32>,
    } else {
    }
    %c0_20 = arith.constant 0 : index
    %c0_21 = arith.constant 0 : index
    %c0_22 = arith.constant 0 : index
    %22 = vector.load %arg11[%c0_20, %c0_21, %c0_22] : memref<10x18x128xf32, #tpu.memory_space<vmem>>, vector<8x16x128xf32>
    %c0_23 = arith.constant 0 : index
    %c1_24 = arith.constant 1 : index
    %c0_25 = arith.constant 0 : index
    %23 = vector.load %arg11[%c0_23, %c1_24, %c0_25] : memref<10x18x128xf32, #tpu.memory_space<vmem>>, vector<8x16x128xf32>
    %c0_26 = arith.constant 0 : index
    %c2 = arith.constant 2 : index
    %c0_27 = arith.constant 0 : index
    %24 = vector.load %arg11[%c0_26, %c2, %c0_27] : memref<10x18x128xf32, #tpu.memory_space<vmem>>, vector<8x16x128xf32>
    %c1_28 = arith.constant 1 : index
    %c0_29 = arith.constant 0 : index
    %c0_30 = arith.constant 0 : index
    %25 = vector.load %arg11[%c1_28, %c0_29, %c0_30] : memref<10x18x128xf32, #tpu.memory_space<vmem>>, vector<8x16x128xf32>
    %c1_31 = arith.constant 1 : index
    %c1_32 = arith.constant 1 : index
    %c0_33 = arith.constant 0 : index
    %26 = vector.load %arg11[%c1_31, %c1_32, %c0_33] : memref<10x18x128xf32, #tpu.memory_space<vmem>>, vector<8x16x128xf32>
    %c1_34 = arith.constant 1 : index
    %c2_35 = arith.constant 2 : index
    %c0_36 = arith.constant 0 : index
    %27 = vector.load %arg11[%c1_34, %c2_35, %c0_36] : memref<10x18x128xf32, #tpu.memory_space<vmem>>, vector<8x16x128xf32>
    %c2_37 = arith.constant 2 : index
    %c0_38 = arith.constant 0 : index
    %c0_39 = arith.constant 0 : index
    %28 = vector.load %arg11[%c2_37, %c0_38, %c0_39] : memref<10x18x128xf32, #tpu.memory_space<vmem>>, vector<8x16x128xf32>
    %c2_40 = arith.constant 2 : index
    %c1_41 = arith.constant 1 : index
    %c0_42 = arith.constant 0 : index
    %29 = vector.load %arg11[%c2_40, %c1_41, %c0_42] : memref<10x18x128xf32, #tpu.memory_space<vmem>>, vector<8x16x128xf32>
    %c2_43 = arith.constant 2 : index
    %c2_44 = arith.constant 2 : index
    %c0_45 = arith.constant 0 : index
    %30 = vector.load %arg11[%c2_43, %c2_44, %c0_45] : memref<10x18x128xf32, #tpu.memory_space<vmem>>, vector<8x16x128xf32>
    %31 = tpu.concatenate %22, %23, %24, %25, %26, %27, %28, %29, %30 in 2 : vector<8x16x128xf32>, vector<8x16x128xf32>, vector<8x16x128xf32>, vector<8x16x128xf32>, vector<8x16x128xf32>, vector<8x16x128xf32>, vector<8x16x128xf32>, vector<8x16x128xf32>, vector<8x16x128xf32> -> vector<8x16x1152xf32>
    %32 = vector.shape_cast %31 : vector<8x16x1152xf32> to vector<128x1152xf32>
    %c0_46 = arith.constant 0 : index
    %c0_47 = arith.constant 0 : index
    %33 = vector.load %arg5[%c0_46, %c0_47] : memref<1152x128xf32, #tpu.memory_space<vmem>>, vector<1152x128xf32>
    %cst_48 = arith.constant dense<0.000000e+00> : vector<128x128xf32>
    %34 = tpu.matmul %32, %33, %cst_48 {dimension_numbers = #tpu.dot_dimension_numbers<[1], [0], [0], [1], [0, 0, 1, 1], [], []>} : vector<128x1152xf32>, vector<1152x128xf32>, vector<128x128xf32> -> vector<128x128xf32>
    %c0_49 = arith.constant 0 : index
    %c0_50 = arith.constant 0 : index
    %35 = vector.load %arg6[%c0_49, %c0_50] : memref<1x128xf32, #tpu.memory_space<vmem>>, vector<1x128xf32>
    %36 = vector.broadcast %35 : vector<1x128xf32> to vector<128x128xf32>
    %37 = arith.addf %34, %36 : vector<128x128xf32>
    %cst_51 = arith.constant 0.000000e+00 : f32
    %38 = vector.broadcast %cst_51 : f32 to vector<128x128xf32>
    %39 = arith.maximumf %37, %38 : vector<128x128xf32>
    %40 = vector.extract_strided_slice %1 {offsets = [1, 0, 0], sizes = [8, 16, 128], strides = [1, 1, 1]} : vector<10x16x128xf32> to vector<8x16x128xf32>
    %41 = vector.shape_cast %40 : vector<8x16x128xf32> to vector<128x128xf32>
    %c0_52 = arith.constant 0 : index
    %c0_53 = arith.constant 0 : index
    %42 = vector.load %arg7[%c0_52, %c0_53] : memref<128x128xf32, #tpu.memory_space<vmem>>, vector<128x128xf32>
    %cst_54 = arith.constant dense<0.000000e+00> : vector<128x128xf32>
    %43 = tpu.matmul %39, %42, %cst_54 {dimension_numbers = #tpu.dot_dimension_numbers<[1], [0], [0], [1], [0, 0, 1, 1], [], []>} : vector<128x128xf32>, vector<128x128xf32>, vector<128x128xf32> -> vector<128x128xf32>
    %c0_55 = arith.constant 0 : index
    %c0_56 = arith.constant 0 : index
    %44 = vector.load %arg8[%c0_55, %c0_56] : memref<128x128xf32, #tpu.memory_space<vmem>>, vector<128x128xf32>
    %cst_57 = arith.constant dense<0.000000e+00> : vector<128x128xf32>
    %45 = tpu.matmul %41, %44, %cst_57 {dimension_numbers = #tpu.dot_dimension_numbers<[1], [0], [0], [1], [0, 0, 1, 1], [], []>} : vector<128x128xf32>, vector<128x128xf32>, vector<128x128xf32> -> vector<128x128xf32>
    %46 = arith.addf %43, %45 : vector<128x128xf32>
    %c0_58 = arith.constant 0 : index
    %c0_59 = arith.constant 0 : index
    %47 = vector.load %arg9[%c0_58, %c0_59] : memref<1x128xf32, #tpu.memory_space<vmem>>, vector<1x128xf32>
    %48 = vector.broadcast %47 : vector<1x128xf32> to vector<128x128xf32>
    %49 = arith.addf %46, %48 : vector<128x128xf32>
    %cst_60 = arith.constant 0.000000e+00 : f32
    %50 = vector.broadcast %cst_60 : f32 to vector<128x128xf32>
    %51 = arith.maximumf %49, %50 : vector<128x128xf32>
    %52 = vector.shape_cast %51 : vector<128x128xf32> to vector<8x16x128xf32>
    %c0_61 = arith.constant 0 : index
    %c0_62 = arith.constant 0 : index
    %c0_63 = arith.constant 0 : index
    %c0_64 = arith.constant 0 : index
    %53 = vector.load %arg10[%c0_61, %c0_62, %c0_63, %c0_64] : memref<1x8x16x128xf32, #tpu.memory_space<vmem>>, vector<1x8x16x128xf32>
    %54 = vector.shape_cast %53 : vector<1x8x16x128xf32> to vector<8x16x128xf32>
    %55 = vector.shape_cast %52 : vector<8x16x128xf32> to vector<1x8x16x128xf32>
    tpu.vector_store %arg10[%c0_61, %c0_62, %c0_63, %c0_64], %55 {strides = array<i32>} : memref<1x8x16x128xf32, #tpu.memory_space<vmem>>, vector<1x8x16x128xf32>,
    return
  }
  func.func @transform_0(%arg0: i32, %arg1: i32) -> (i32, i32, i32, i32, i32) {
    %c0_i32 = arith.constant 0 : i32
    %c0_i32_0 = arith.constant 0 : i32
    %c0_i32_1 = arith.constant 0 : i32
    %c0_i32_2 = arith.constant 0 : i32
    return %arg0, %arg1, %c0_i32, %c0_i32_0, %c0_i32_1 : i32, i32, i32, i32, i32
  }
  func.func @transform_1(%arg0: i32, %arg1: i32) -> (i32, i32) {
    %c0_i32 = arith.constant 0 : i32
    %c0_i32_0 = arith.constant 0 : i32
    %c0_i32_1 = arith.constant 0 : i32
    return %c0_i32, %c0_i32_0 : i32, i32
  }
  func.func @transform_2(%arg0: i32, %arg1: i32) -> (i32, i32) {
    %c0_i32 = arith.constant 0 : i32
    %c0_i32_0 = arith.constant 0 : i32
    %c0_i32_1 = arith.constant 0 : i32
    return %c0_i32, %c0_i32_0 : i32, i32
  }
  func.func @transform_3(%arg0: i32, %arg1: i32) -> (i32, i32) {
    %c0_i32 = arith.constant 0 : i32
    %c0_i32_0 = arith.constant 0 : i32
    %c0_i32_1 = arith.constant 0 : i32
    return %c0_i32, %c0_i32_0 : i32, i32
  }
  func.func @transform_4(%arg0: i32, %arg1: i32) -> (i32, i32) {
    %c0_i32 = arith.constant 0 : i32
    %c0_i32_0 = arith.constant 0 : i32
    %c0_i32_1 = arith.constant 0 : i32
    return %c0_i32, %c0_i32_0 : i32, i32
  }
  func.func @transform_5(%arg0: i32, %arg1: i32) -> (i32, i32) {
    %c0_i32 = arith.constant 0 : i32
    %c0_i32_0 = arith.constant 0 : i32
    %c0_i32_1 = arith.constant 0 : i32
    return %c0_i32, %c0_i32_0 : i32, i32
  }
  func.func @transform_6(%arg0: i32, %arg1: i32) -> (i32, i32) {
    %c0_i32 = arith.constant 0 : i32
    %c0_i32_0 = arith.constant 0 : i32
    %c0_i32_1 = arith.constant 0 : i32
    return %c0_i32, %c0_i32_0 : i32, i32
  }
  func.func @transform_7(%arg0: i32, %arg1: i32) -> (i32, i32) {
    %c0_i32 = arith.constant 0 : i32
    %c0_i32_0 = arith.constant 0 : i32
    %c0_i32_1 = arith.constant 0 : i32
    return %c0_i32, %c0_i32_0 : i32, i32
  }
  func.func @transform_8(%arg0: i32, %arg1: i32) -> (i32, i32, i32, i32) {
    %c0_i32 = arith.constant 0 : i32
    %c0_i32_0 = arith.constant 0 : i32
    %c0_i32_1 = arith.constant 0 : i32
    return %arg0, %arg1, %c0_i32, %c0_i32_0 : i32, i32, i32, i32
  }
}

</mosaic_0001>

<bundles_post_ra>
// kernel: tpu_custom_call.1
= control target key start
LH: loop header
LB: loop body
LE: loop exit
PB: predicated region body
PF: predicated region fallthrough
CT: control target
= control target key end

     0   :  { %s4553_s0 = inlined_call_operand.hbm [shape: f32[2,2,10,16,128], index: 0, kind: input, shape index: {}]   ;;  %s4554_s1 = inlined_call_operand.hbm [shape: f32[128,128], index: 1, kind: input, shape index: {}]   ;;  %s4555_s2 = inlined_call_operand.vmem [shape: f32[1,128], index: 2, kind: input, shape index: {}]   ;;  %s4556_s3 = inlined_call_operand.hbm [shape: f32[1152,128], index: 3, kind: input, shape index: {}]   ;;  %s4557_s4 = inlined_call_operand.vmem [shape: f32[1,128], index: 4, kind: input, shape index: {}]   ;;  %s4558_s5 = inlined_call_operand.hbm [shape: f32[128,128], index: 5, kind: input, shape index: {}]   ;;  %s4559_s6 = inlined_call_operand.hbm [shape: f32[128,128], index: 6, kind: input, shape index: {}]   ;;  %s4560_s7 = inlined_call_operand.vmem [shape: f32[1,128], index: 7, kind: input, shape index: {}]   ;;  %s4561_s8 = inlined_call_operand.hbm [shape: f32[2,16,16,128], index: 8, kind: output, shape index: {}]  }
   0x1   :  { %4573 = sst [smem:[#allocation23_spill]] %s4554_s1 }
   0x2   :  { %4574 = sst [smem:[#allocation24_spill]] %s4556_s3 }
   0x3   :  { %4575 = sst [smem:[#allocation25_spill]] %s4557_s4 }
   0x4   :  { %4576 = sst [smem:[#allocation26_spill]] %s4558_s5 }
   0x5   :  { %4577 = sst [smem:[#allocation27_spill]] %s4560_s7 }
   0x6   :  { %4578 = sst [smem:[#allocation28_spill]] %s4561_s8 }
   0x7   :  { %13 = vsyncpa [#allocation4], 0 }
   0x8   :  { %15 = vsyncpa [#allocation4 + $0x1], 0 }
   0x9   :  { %16 = vsyncpa [#allocation7], 0 }
   0xa   :  { %17 = vsyncpa [#allocation10], 0 }
   0xb   :  { %18 = vsyncpa [#allocation5], 0 }
   0xc   :  { %20 = vsyncpa [#allocation5 + $0x1], 0  ;;  %s3680_s27 = smov 0   ;;  %s3682_s28 = smov 0  }
   0xd   :  { %s3684_s29 = smov 0   ;;  %s3686_s30 = smov 0  }
   0xe   :  { %s3688_s9 = smov 0   ;;  %s3690_s10 = smov 0  }
   0xf   :  { %s3692_s11 = smov 0   ;;  %s3694_s12 = smov 0  }
  0x10 LB: > { %4579 = sst [smem:[#allocation17_spill]] %s3592_s27  ;;  %s2244_s13 = sadd.s32 4294967295, %s3620_s12   ;;  %s3620_s12 = sphi %s3694_s12, %s26_s12   ;;  %s3616_s11 = sphi %s3692_s11, %s4622_s11   ;;  %s3612_s10 = sphi %s3690_s10, %s4621_s10   ;;  %s3608_s9 = sphi %s3688_s9, %s4620_s9   ;;  %s3604_s30 = sphi %s3686_s30, %s4619_s30   ;;  %s3600_s29 = sphi %s3684_s29, %s4618_s29   ;;  %s3596_s28 = sphi %s3682_s28, %s4617_s28   ;;  %s3592_s27 = sphi %s3680_s27, %s4616_s27  }
  0x11   : > { %4580 = sst [smem:[#allocation18_spill]] %s3604_s30  ;;  %s2245_s14 = sadd.s32 4294967294, %s3620_s12  }
  0x12   : > { %4581 = sst [smem:[#allocation19_spill]] %s3608_s9  ;;  %p60_p0 = scmp.ne.s32.totalorder %s3596_s28, %s3592_s27 }
  0x13   : > { %p3724_p1 = scmp.eq.s32.totalorder %s2244_s13, 0  ;;  %p3728_p2 = scmp.eq.s32.totalorder %s2244_s13, 3 }
  0x14   : > { %p239_p3 = scmp.eq.s32.totalorder %s2245_s14, 3  ;;  %p2246_p5 = scmp.ge.s32.totalorder %s3620_s12, 1 }
  0x15   : > { %s4582_s15 = scalar_select %p3724_p1, 1, 0 }
  0x16   : > { %s4583_s16 = scalar_select %p3728_p2, 1, 0 }
  0x17   : > { %p3734_p4 = por %p3724_p1, %p60_p0  ;;  %p3739_p6 = por %p239_p3, %p60_p0 }
  0x18   : > { %p246_p7 = scmp.lt.s32.totalorder %s3620_s12, 5  ;;  %s3622_s20 = smov [#allocation6]  }
  0x19   : > { %s4584_s17 = scalar_select %p3734_p4, 1, 0 }
  0x1a   : > { %s4585_s18 = scalar_select %p3739_p6, 1, 0 }
  0x1b   : > { %p3744_p8 = pnand %p2246_p5, %p246_p7  ;;  %s258_s21 = sshll.u32 %s3622_s20, 4  ;;  %s3748_s21 = int_to_ptr.vmem [resolvable:$true] %s258_s21 }
  0x1c   : > { %4586 = sst [smem:[#allocation20_spill]] %s4585_s18  ;;  %s3623_s23 = smov [#allocation9]  }
  0x1d   : > { %s4587_s19 = scalar_select %p3744_p8, 1, 0 }
  0x1e   : > { %p3266_p9 = pneg %p3744_p8  ;;  %s290_s24 = sshll.u32 %s3623_s23, 4  ;;  %s3758_s24 = int_to_ptr.vmem [resolvable:$true] %s290_s24 }
  0x1f   : > { %s3624_s25 = smov [#allocation8]   ;;  %s4589_s1 = sld [smem:[#allocation23_spill]] }
  0x20   : > { %p3754_p10 = pnand %p3266_p9, %p3724_p1  ;;  %s3760_s26 = sshll.u32 %s3624_s25, 4  ;;  %s275_s26 = int_to_ptr.vmem [resolvable:$true] %s3760_s26 }
  0x22   : > { %p3770_p12 = pneg %p3754_p10 }
  0x25   : > { %s3372_s20 = scalar_lea.hbm %s4589_s1, 2048 }
  0x26   : > { %p3373_p11 = scmp.ne.s32.totalorder %s4589_s1, %s3372_s20  ;;  %p3379_p3 = scmp.lt.u32.totalorder %s3372_s20, %s4589_s1 }
  0x28   : > { %p3375_p13 = pnand %p3770_p12, %p3373_p11 }
  0x2a   : > { %p3376_p0 = pneg %p3375_p13 }
  0x2c   : > { %p3381_p5 = pnand %p3379_p3, %p3376_p0 }
  0x2e   : > { %3384 = shalt.err (!%p3381_p5)
}
  0x2f   : > { %s3385_s27 = scalar_lea.vmem %s3748_s21, 2048  ;;  %p3393_p1 = scmp.lt.s32.totalorder %s3748_s21, %s3748_s21 }
  0x30   : > { %p3386_p7 = scmp.ne.s32.totalorder %s3748_s21, %s3385_s27  ;;  %p3394_p4 = scmp.lt.s32.totalorder %s3385_s27, %s3385_s27 }
  0x32   : > { %p3388_p9 = pnand %p3386_p7, %p3770_p12  ;;  %p3395_p11 = por %p3394_p4, %p3393_p1 }
  0x34   : > { %p3389_p6 = pneg %p3388_p9 }
  0x36   : > { %p3396_p13 = pnand %p3395_p11, %p3389_p6 }
  0x38   : > { %3399 = shalt.err (!%p3396_p13)
}
  0x39   : > { %s4569_s18 = smov 128   ;;  %s4570_s13 = smov 8  }
  0x3a   : > { %3269 = dma.hbm_to_vmem [thread:$0]  (!%p3754_p10), %s4589_s1, 2048, %s3748_s21, [#allocation7], %s4569_s18, %s4569_s18, %s4570_s13  }
  0x3b   : > { %s4591_s5 = sld [smem:[#allocation26_spill]] }
  0x41   : > { %s3400_s27 = scalar_lea.hbm %s4591_s5, 2048 }
  0x42   : > { %p3401_p1 = scmp.ne.s32.totalorder %s4591_s5, %s3400_s27  ;;  %p3407_p0 = scmp.lt.u32.totalorder %s3400_s27, %s4591_s5 }
  0x44   : > { %p3403_p4 = pnand %p3401_p1, %p3770_p12 }
  0x46   : > { %p3404_p6 = pneg %p3403_p4 }
  0x48   : > { %p3409_p3 = pnand %p3407_p0, %p3404_p6 }
  0x4a   : > { %3412 = shalt.err (!%p3409_p3)
}
  0x4b   : > { %s3413_s21 = scalar_lea.vmem %s3758_s24, 2048  ;;  %p3421_p11 = scmp.lt.s32.totalorder %s3758_s24, %s3758_s24 }
  0x4c   : > { %p3414_p5 = scmp.ne.s32.totalorder %s3758_s24, %s3413_s21  ;;  %p3422_p13 = scmp.lt.s32.totalorder %s3413_s21, %s3413_s21 }
  0x4e   : > { %p3416_p7 = pnand %p3414_p5, %p3770_p12  ;;  %p3423_p1 = por %p3422_p13, %p3421_p11 }
  0x50   : > { %p3417_p9 = pneg %p3416_p7 }
  0x52   : > { %p3424_p4 = pnand %p3423_p1, %p3417_p9 }
  0x54   : > { %3427 = shalt.err (!%p3424_p4)
}
  0x55   : > { %3275 = dma.hbm_to_vmem [thread:$0]  (!%p3754_p10), %s4591_s5, 2048, %s3758_s24, [#allocation10], %s4569_s18, %s4569_s18, %s4570_s13  }
  0x56   : > { %s4592_s3 = sld [smem:[#allocation24_spill]] }
  0x5c   : > { %s3428_s14 = scalar_lea.hbm %s4592_s3, 18432 }
  0x5d   : > { %p3429_p6 = scmp.ne.s32.totalorder %s4592_s3, %s3428_s14  ;;  %p3435_p5 = scmp.lt.u32.totalorder %s3428_s14, %s4592_s3 }
  0x5f   : > { %p3431_p0 = pnand %p3429_p6, %p3770_p12 }
  0x61   : > { %p3432_p3 = pneg %p3431_p0 }
  0x63   : > { %p3437_p7 = pnand %p3435_p5, %p3432_p3 }
  0x65   : > { %3440 = shalt.err (!%p3437_p7)
}
  0x66   : > { %s3441_s21 = scalar_lea.vmem %s275_s26, 18432  ;;  %p3449_p1 = scmp.lt.s32.totalorder %s275_s26, %s275_s26 }
  0x67   : > { %p3442_p9 = scmp.ne.s32.totalorder %s275_s26, %s3441_s21  ;;  %p3450_p4 = scmp.lt.s32.totalorder %s3441_s21, %s3441_s21 }
  0x69   : > { %p3444_p11 = pnand %p3442_p9, %p3770_p12  ;;  %p3451_p8 = por %p3450_p4, %p3449_p1 }
  0x6b   : > { %p3445_p13 = pneg %p3444_p11 }
  0x6d   : > { %p3452_p2 = pnand %p3451_p8, %p3445_p13 }
  0x6f   : > { %3455 = shalt.err (!%p3452_p2)
}
  0x70   : > { %3272 = dma.hbm_to_vmem [thread:$0]  (!%p3754_p10), %s4592_s3, 18432, %s275_s26, [#allocation7], %s4569_s18, %s4569_s18, %s4570_s13  }
  0x71   : > { %s3627_s7 = smov [#allocation11]   ;;  %s3456_s20 = scalar_lea.hbm %s4559_s6, 2048 }
  0x72   : > { %s303_s30 = sshll.u32 %s3627_s7, 4  ;;  %p3457_p2 = scmp.ne.s32.totalorder %s4559_s6, %s3456_s20  ;;  %s304_s30 = int_to_ptr.vmem [resolvable:$true] %s303_s30 }
  0x73   : > { %p3463_p0 = scmp.lt.u32.totalorder %s3456_s20, %s4559_s6 }
  0x74   : > { %p3459_p8 = pnand %p3457_p2, %p3770_p12 }
  0x76   : > { %p3460_p6 = pneg %p3459_p8 }
  0x78   : > { %p3465_p3 = pnand %p3463_p0, %p3460_p6 }
  0x7a   : > { %3468 = shalt.err (!%p3465_p3)
}
  0x7b   : > { %s3469_s26 = scalar_lea.vmem %s304_s30, 2048  ;;  %p3477_p11 = scmp.lt.s32.totalorder %s304_s30, %s304_s30 }
  0x7c   : > { %p3470_p5 = scmp.ne.s32.totalorder %s304_s30, %s3469_s26  ;;  %p3478_p13 = scmp.lt.s32.totalorder %s3469_s26, %s3469_s26 }
  0x7e   : > { %p3472_p7 = pnand %p3470_p5, %p3770_p12  ;;  %p3479_p1 = por %p3478_p13, %p3477_p11 }
  0x80   : > { %p3473_p9 = pneg %p3472_p7 }
  0x82   : > { %p3480_p4 = pnand %p3479_p1, %p3473_p9 }
  0x84   : > { %3483 = shalt.err (!%p3480_p4)
}
  0x85   : > { %3278 = dma.hbm_to_vmem [thread:$0]  (!%p3754_p10), %s4559_s6, 2048, %s304_s30, [#allocation10], %s4569_s18, %s4569_s18, %s4570_s13  }
  0x86   : > { %s35_s8 = sadd.s32 1, %s3612_s10  ;;  %s38_s22 = sadd.s32 1, %s3616_s11 }
  0x87   : > { %p36_p12 = scmp.ge.s32.totalorder %s35_s8, 2  ;;  %s47_s7 = sadd.s32 1, %s3600_s29 }
  0x88   : > { %p54_p2 = scmp.ne.s32.totalorder %s3600_s29, %s3596_s28  ;;  %p55_p8 = scmp.eq.s32.totalorder %s3620_s12, 0 }
  0x89   : > { %s4624_s8 = smov (%p36_p12, %s35_s8), 0  ;;  %s4626_s22 = smov (!%p36_p12, %s38_s22), %s3616_s11 }
  0x8a   : > { %s43_s9 = ssub.s32 %s3612_s10, %s4624_s8  ;;  %p3874_p6 = por %p55_p8, %p54_p2 }
  0x8b   : > { %p40_p10 = scmp.ge.s32.totalorder %s4626_s22, 2  ;;  %p4594_p0 = scmp.ne.s32.totalorder %s4583_s16, 0 }
  0x8c   : > { %p3291_p5 = scmp.lt.s32.totalorder %s3620_s12, 4  ;;  %s320_s20 = sand.u32 1, %s3600_s29  }
  0x8d   : > { %p3880_p3 = por %p4594_p0, %p54_p2  ;;  %s4628_s22 = smov (%p40_p10, %s4626_s22), 0 }
  0x8e   : > { %s3242_s23 = smul.u32 160, %s320_s20  ;;  %s42_s25 = ssub.s32 %s3616_s11, %s4628_s22 }
  0x8f   : > { %s3243_s27 = smul.u32 20, %s3612_s10  ;;  %s44_s21 = sor.u32 %s43_s9, %s42_s25 }
  0x90   : > { %p45_p7 = scmp.eq.s32.totalorder %s44_s21, 0  ;;  %s3244_s26 = smul.u32 40, %s3616_s11 }
  0x91   : > { %s324_s24 = scalar_lea.vmem [#allocation3], %s3242_s23  ;;  %p3894_p9 = pnand %p3291_p5, %p3874_p6 }
  0x92   : > { %s333_s4 = sshll.u32 %s324_s24, 4  ;;  %s330_s13 = sadd.s32 %s3244_s26, %s3243_s27  ;;  %s3901_s4 = int_to_ptr.vmem [resolvable:$true] %s333_s4 }
  0x93   : > { %s3899_s18 = scalar_select %p45_p7, %s3600_s29, %s47_s7  }
  0x94   : > { %s2252_s1 = sshll.u32 %s330_s13, 7  ;;  %s3908_s14 = scalar_lea.sflag [#allocation4], %s320_s20 }
  0x95   : > { %s3906_s9 = scalar_lea.hbm %s4553_s0, %s2252_s1  ;;  %p3486_p13 = pneg %p3894_p9 }
  0x96   : > { %s3484_s23 = scalar_lea.hbm %s3906_s9, 2560  ;;  %s3489_s3 = scalar_lea.hbm %s4553_s0, 10240 }
  0x97   : > { %p3485_p11 = scmp.ne.s32.totalorder %s3906_s9, %s3484_s23  ;;  %p3490_p12 = scmp.lt.u32.totalorder %s3906_s9, %s4553_s0 }
  0x98   : > { %p3491_p2 = scmp.lt.u32.totalorder %s3489_s3, %s3484_s23  ;;  %p3493_p6 = scmp.lt.u32.totalorder %s3484_s23, %s3906_s9 }
  0x99   : > { %p3487_p1 = pnand %p3486_p13, %p3485_p11 }
  0x9a   : > { %p3492_p8 = por %p3491_p2, %p3490_p12 }
  0x9b   : > { %p3488_p4 = pneg %p3487_p1 }
  0x9c   : > { %p3494_p10 = por %p3493_p6, %p3492_p8 }
  0x9e   : > { %p3495_p0 = pnand %p3494_p10, %p3488_p4 }
  0xa0   : > { %3498 = shalt.err (!%p3495_p0)
}
  0xa1   : > { %s3499_s20 = scalar_lea.vmem %s3901_s4, 2560  ;;  %s3628_s25 = smov [#allocation3]  }
  0xa2   : > { %p3500_p5 = scmp.ne.s32.totalorder %s3901_s4, %s3499_s20  ;;  %s3504_s27 = sshll.u32 %s3628_s25, 4  ;;  %s3505_s27 = int_to_ptr.vmem [resolvable:$false] %s3504_s27 }
  0xa3   : > { %s3506_s21 = scalar_lea.vmem %s3505_s27, 5120  ;;  %p3507_p1 = scmp.lt.s32.totalorder %s3901_s4, %s3505_s27 }
  0xa4   : > { %p3502_p7 = pnand %p3500_p5, %p3486_p13  ;;  %p3508_p12 = scmp.lt.s32.totalorder %s3506_s21, %s3499_s20 }
  0xa6   : > { %p3503_p11 = pneg %p3502_p7  ;;  %p3509_p2 = por %p3508_p12, %p3507_p1 }
  0xa8   : > { %p3510_p8 = pnand %p3509_p2, %p3503_p11 }
  0xaa   : > { %3513 = shalt.err (!%p3510_p8)
}
  0xab   : > { %s4597_s26 = smov 8   ;;  %s4598_s24 = smov 128  }
  0xac   : > { %3282 = dma.hbm_to_vmem [thread:$0]  (!%p3894_p9), %s3906_s9, 2560, %s3901_s4, %s3908_s14, %s4598_s24, %s4598_s24, %s4597_s26  }
  0xad   : > { %p4599_p13 = scmp.ne.s32.totalorder %s4587_s19, 0 }
  0xaf   : > { %345 = sbr.rel (%p4599_p13) target bundleno = 1137 (0x471), region = 52 }
  0xb6   : > { %s3942_s23 = sand.u32 1, %s3596_s28   ;;  %p4600_p4 = scmp.ne.s32.totalorder %s4584_s17, 0 }
  0xb7   : > { %s3245_s13 = smul.u32 160, %s3942_s23  ;;  %s348_s7 = scalar_lea.sflag [#allocation4], %s3942_s23 }
  0xb9   : > { %s3946_s3 = scalar_lea.vmem [#allocation3], %s3245_s13 }
  0xba   : > { %3575 = dma.done.wait (%p4600_p4), %s348_s7, 2560  }
  0xbb   : > { %3577 = vsyncadd (%p4600_p4), %s348_s7, 4294964736  ;;  %p4601_p9 = scmp.ne.s32.totalorder %s4582_s15, 0 }
  0xbd   : > { %3579 = dma.done.wait (%p4601_p9), [#allocation7], 20480  }
  0xbe   : > { %3581 = vsyncadd (%p4601_p9), [#allocation7], 4294946816 }
  0xbf   : > { %3583 = dma.done.wait (%p4601_p9), [#allocation10], 4096  }
  0xc0   : > { %3585 = vsyncadd (%p4601_p9), [#allocation10], 4294963200  ;;  %s2258_s19 = sshll.u32 %s3942_s23, 7  ;;  %v3629_v0 = vmov 0.0   ;;  %v421_v1 = vld [vmem:[#allocation6] sm:$0xff]  ;;  %v422_v2 = vld [vmem:[#allocation6 + $0x8] sm:$0xff] }
  0xc1   : > { %649 = vst [vmem:[#allocation2] sm:$0x1] %v3629_v0  ;;  %650 = vst [vmem:[#allocation2 + $0x18] sm:$0x1] %v3629_v0  ;;  %v423_v3 = vld [vmem:[#allocation6 + $0x10] sm:$0xff]  ;;  %v2954_v4 = vpack.c.bf16 %v422_v2, %v421_v1  ;;  %v424_v5 = vld [vmem:[#allocation6 + $0x18] sm:$0xff] }
  0xc2   : > { %651 = vst [vmem:[#allocation2 + $0x30] sm:$0x1] %v3629_v0  ;;  %652 = vst [vmem:[#allocation2 + $0x48] sm:$0x1] %v3629_v0  ;;  %v2958_v6 = vpack.c.bf16 %v424_v5, %v423_v3  ;;  %v425_v7 = vld [vmem:[#allocation6 + $0x20] sm:$0xff]  ;;  %v426_v8 = vld [vmem:[#allocation6 + $0x28] sm:$0xff] }
  0xc3   : > { %653 = vst [vmem:[#allocation2 + $0x60] sm:$0x1] %v3629_v0  ;;  %654 = vst [vmem:[#allocation2 + $0x78] sm:$0x1] %v3629_v0  ;;  %2955 = vmatprep.subr.bf16.mxu0 %v2954_v4  ;;  %v2962_v9 = vpack.c.bf16 %v426_v8, %v425_v7  ;;  %v401_v10 = vld [vmem:[%s3946_s3] sm:$0xff]  ;;  %v427_v11 = vld [vmem:[#allocation6 + $0x30] sm:$0xff] }
  0xc4   : > { %655 = vst [vmem:[#allocation2 + $0x90] sm:$0x1] %v3629_v0  ;;  %656 = vst [vmem:[#allocation2 + $0xa8] sm:$0x1] %v3629_v0  ;;  %2957 = vmatpush3.bf16.msra.mxu0 %v2954_v4  ;;  %v428_v12 = vld [vmem:[#allocation6 + $0x38] sm:$0xff]  ;;  %2756 = vmatprep.mubr.f32.mxu0 %v401_v10  ;;  %v429_v14 = vld [vmem:[#allocation6 + $0x40] sm:$0xff] }
  0xc5   : > { %657 = vst [vmem:[#allocation2 + $0xc0] sm:$0x1] %v3629_v0  ;;  %658 = vst [vmem:[#allocation2 + $0xd8] sm:$0x1] %v3629_v0  ;;  %2959 = vmatprep.subr.bf16.mxu0 %v2958_v6  ;;  %v2966_v13 = vpack.c.bf16 %v428_v12, %v427_v11  ;;  %v430_v15 = vld [vmem:[#allocation6 + $0x48] sm:$0xff]  ;;  %v431_v17 = vld [vmem:[#allocation6 + $0x50] sm:$0xff] }
  0xc6   : > { %659 = vst [vmem:[#allocation2 + $0x11] sm:$0x1] %v3629_v0  ;;  %660 = vst [vmem:[#allocation2 + $0x29] sm:$0x1] %v3629_v0  ;;  %v2970_v16 = vpack.c.bf16 %v430_v15, %v429_v14  ;;  %v432_v18 = vld [vmem:[#allocation6 + $0x58] sm:$0xff]  ;;  %v433_v20 = vld [vmem:[#allocation6 + $0x60] sm:$0xff] }
  0xc7   : > { %661 = vst [vmem:[#allocation2 + $0x41] sm:$0x1] %v3629_v0  ;;  %662 = vst [vmem:[#allocation2 + $0x59] sm:$0x1] %v3629_v0  ;;  %v2974_v19 = vpack.c.bf16 %v432_v18, %v431_v17  ;;  %v434_v21 = vld [vmem:[#allocation6 + $0x68] sm:$0xff]  ;;  %v435_v23 = vld [vmem:[#allocation6 + $0x70] sm:$0xff] }
  0xc8   : > { %663 = vst [vmem:[#allocation2 + $0x71] sm:$0x1] %v3629_v0  ;;  %664 = vst [vmem:[#allocation2 + $0x89] sm:$0x1] %v3629_v0  ;;  %2961 = vmatpush3.bf16.msra.mxu0 %v2958_v6  ;;  %v2978_v22 = vpack.c.bf16 %v434_v21, %v433_v20  ;;  %v436_v24 = vld [vmem:[#allocation6 + $0x78] sm:$0xff]  ;;  %v402_v26 = vld [vmem:[%s3946_s3 + $0x8] sm:$0xff] }
  0xc9   : > { %665 = vst [vmem:[#allocation2 + $0xa1] sm:$0x1] %v3629_v0  ;;  %666 = vst [vmem:[#allocation2 + $0xb9] sm:$0x1] %v3629_v0  ;;  %2963 = vmatprep.subr.bf16.mxu0 %v2962_v9  ;;  %v2982_v25 = vpack.c.bf16 %v436_v24, %v435_v23  ;;  %v3964_v27 = vld [vmem:[%s3946_s3 + $0x10] sm:$0xff]  ;;  %v3968_v28 = vld [vmem:[%s3946_s3 + $0x18] sm:$0xff] }
  0xca   : > { %667 = vst [vmem:[#allocation2 + $0xd1] sm:$0x1] %v3629_v0  ;;  %668 = vst [vmem:[#allocation2 + $0xe9] sm:$0x1] %v3629_v0  ;;  %v3971_v29 = vld [vmem:[%s3946_s3 + $0x20] sm:$0xff]  ;;  %v3976_v30 = vld [vmem:[%s3946_s3 + $0x28] sm:$0xff] }
  0xcb   : > { %v3979_v31 = vld [vmem:[%s3946_s3 + $0x30] sm:$0xff]  ;;  %v3984_v32 = vld [vmem:[%s3946_s3 + $0x38] sm:$0xff]  ;;  %v3987_v33 = vld [vmem:[%s3946_s3 + $0x40] sm:$0xff]  ;;  %s4056_s4 = scalar_lea.vmem [#allocation12], %s2258_s19  ;;  %s4604_s16 = sld [smem:[#allocation18_spill]] }
  0xcc   : > { %2965 = vmatpush3.bf16.msra.mxu0 %v2962_v9  ;;  %v3992_v34 = vld [vmem:[%s3946_s3 + $0x48] sm:$0xff]  ;;  %v3995_v35 = vld [vmem:[%s3946_s3 + $0x50] sm:$0xff]  ;;  %v4000_v36 = vld [vmem:[%s3946_s3 + $0x58] sm:$0xff] }
  0xcd   : > { %2967 = vmatprep.subr.bf16.mxu0 %v2966_v13  ;;  %v4003_v37 = vld [vmem:[%s3946_s3 + $0x60] sm:$0xff]  ;;  %v4008_v38 = vld [vmem:[%s3946_s3 + $0x68] sm:$0xff]  ;;  %v4011_v39 = vld [vmem:[%s3946_s3 + $0x70] sm:$0xff] }
  0xce   : > { %v4016_v40 = vld [vmem:[%s3946_s3 + $0x78] sm:$0xff]  ;;  %v4019_v41 = vld [vmem:[%s3946_s3 + $0x80] sm:$0xff]  ;;  %v4024_v42 = vld [vmem:[%s3946_s3 + $0x88] sm:$0xff] }
  0xcf   : > { %4602 = vst [vmem:[#allocation21_spill] sm:$0xff] %v4019_v41  ;;  %4603 = vst [vmem:[#allocation22_spill] sm:$0xff] %v4024_v42  ;;  %v419_v43 = vld [vmem:[%s3946_s3 + $0x90] sm:$0xff]  ;;  %v420_v44 = vld [vmem:[%s3946_s3 + $0x98] sm:$0xff] }
  0xd0   : > { %2969 = vmatpush3.bf16.msra.mxu0 %v2966_v13  ;;  %v4032_v45 = vld [vmem:[%s4555_s2] ss:$0 sm:$0xff] }
  0xd1   : > { %2971 = vmatprep.subr.bf16.mxu0 %v2970_v16  ;;  %p2260_p6 = scmp.ne.s32.totalorder %s4604_s16, 0 }
  0xd4   : > { %2973 = vmatpush3.bf16.msra.mxu0 %v2970_v16 }
  0xd5   : > { %2975 = vmatprep.subr.bf16.mxu0 %v2974_v19 }
  0xd8   : > { %2977 = vmatpush3.bf16.msra.mxu0 %v2974_v19 }
  0xd9   : > { %2979 = vmatprep.subr.bf16.mxu0 %v2978_v22 }
  0xdc   : > { %2981 = vmatpush3.bf16.msra.mxu0 %v2978_v22 }
  0xdd   : > { %2983 = vmatprep.subr.bf16.mxu0 %v2982_v25 }
  0xe0   : > { %2985 = vmatpush3.bf16.msra.mxu0 %v2982_v25 }
  0xe3   : > { %2757 = vmatmul.mubr.f32.vlgmr.msra.gmra.mrb[0].mxu0 %v402_v26 }
  0xe4   : > { %2759 = vmatprep.mubr.f32.mxu0 %v3964_v27 }
  0xe7   : > { %2760 = vmatmul.mubr.f32.gmra.mrb[2].mxu0 %v3968_v28 }
  0xe8   : > { %2762 = vmatprep.mubr.f32.mxu0 %v3971_v29 }
  0xeb   : > { %2763 = vmatmul.mubr.f32.gmra.mrb[4].mxu0 %v3976_v30 }
  0xec   : > { %2765 = vmatprep.mubr.f32.mxu0 %v3979_v31 }
  0xef   : > { %2766 = vmatmul.mubr.f32.gmra.mrb[6].mxu0 %v3984_v32 }
  0xf0   : > { %2768 = vmatprep.mubr.f32.mxu0 %v3987_v33 }
  0xf3   : > { %2769 = vmatmul.mubr.f32.gmra.mrb[8].mxu0 %v3992_v34 }
  0xf4   : > { %2771 = vmatprep.mubr.f32.mxu0 %v3995_v35 }
  0xf7   : > { %2772 = vmatmul.mubr.f32.gmra.mrb[10].mxu0 %v4000_v36 }
  0xf8   : > { %2774 = vmatprep.mubr.f32.mxu0 %v4003_v37 }
  0xfb   : > { %2775 = vmatmul.mubr.f32.gmra.mrb[12].mxu0 %v4008_v38 }
  0xfc   : > { %2777 = vmatprep.mubr.f32.mxu0 %v4011_v39 }
  0xff   : > { %2778 = vmatmul.mubr.f32.gmra.mrb[14].mxu0 %v4016_v40 }
 0x100   : > { %2780 = vmatprep.mubr.f32.mxu0 %v4019_v41 }
 0x103   : > { %2781 = vmatmul.mubr.f32.gmra.mrb[16].mxu0 %v4024_v42 }
 0x104   : > { %2783 = vmatprep.mubr.f32.mxu0 %v419_v43 }
 0x107   : > { %2784 = vmatmul.mubr.f32.gmra.mrb[18].mxu0 %v420_v44 }
 0x1b6   : > { %v2758_v46 = vpop.f32.mrb[0].mxu0 }
 0x1b7   : > { %v516_v47 = vadd.f32 %v2758_v46, %v4032_v45  ;;  %v510_v48 = vpop.f32.mrb[1].mxu0 }
 0x1b8   : > { %v511_v49 = vadd.f32 %v4032_v45, %v510_v48 }
 0x1b9   : > { %v610_v50 = vmax.f32 %v516_v47, 0.0 }
 0x1ba   : > { %v609_v51 = vmax.f32 %v511_v49, 0.0  ;;  %v2761_v52 = vpop.f32.mrb[2].mxu0 }
 0x1bb   : > { %630 = vst [vmem:[#allocation2 + $0x9] sm:$0xff] %v610_v50  ;;  %v526_v53 = vadd.f32 %v2761_v52, %v4032_v45  ;;  %v520_v54 = vpop.f32.mrb[3].mxu0 }
 0x1bc   : > { %629 = vst [vmem:[#allocation2 + $0x1] sm:$0xff] %v609_v51  ;;  %v521_v55 = vadd.f32 %v4032_v45, %v520_v54 }
 0x1bd   : > { %v612_v56 = vmax.f32 %v526_v53, 0.0 }
 0x1be   : > { %v611_v57 = vmax.f32 %v521_v55, 0.0  ;;  %v2764_v58 = vpop.f32.mrb[4].mxu0 }
 0x1bf   : > { %632 = vst [vmem:[#allocation2 + $0x21] sm:$0xff] %v612_v56  ;;  %v536_v59 = vadd.f32 %v2764_v58, %v4032_v45  ;;  %v530_v60 = vpop.f32.mrb[5].mxu0 }
 0x1c0   : > { %631 = vst [vmem:[#allocation2 + $0x19] sm:$0xff] %v611_v57  ;;  %v531_v61 = vadd.f32 %v4032_v45, %v530_v60 }
 0x1c1   : > { %v614_v62 = vmax.f32 %v536_v59, 0.0  ;;  %v3630_v59 = vmov (!%p2260_p6), 0.0  }
 0x1c2   : > { %v613_v63 = vmax.f32 %v531_v61, 0.0  ;;  %v2767_v0 = vpop.f32.mrb[6].mxu0  ;;  %673 = vst [vmem:[#allocation2] sm:$0xff] (!%p2260_p6), %v3630_v59  ;;  %674 = vst [vmem:[#allocation2 + $0x8] sm:$0xff] (!%p2260_p6), %v3630_v59 }
 0x1c3   : > { %634 = vst [vmem:[#allocation2 + $0x39] sm:$0xff] %v614_v62  ;;  %v546_v1 = vadd.f32 %v2767_v0, %v4032_v45  ;;  %v540_v2 = vpop.f32.mrb[7].mxu0  ;;  %675 = vst [vmem:[#allocation2 + $0x10] sm:$0x3] (!%p2260_p6), %v3630_v59 }
 0x1c4   : > { %633 = vst [vmem:[#allocation2 + $0x31] sm:$0xff] %v613_v63  ;;  %v541_v3 = vadd.f32 %v4032_v45, %v540_v2 }
 0x1c5   : > { %v616_v4 = vmax.f32 %v546_v1, 0.0 }
 0x1c6   : > { %v615_v5 = vmax.f32 %v541_v3, 0.0  ;;  %v2770_v6 = vpop.f32.mrb[8].mxu0 }
 0x1c7   : > { %636 = vst [vmem:[#allocation2 + $0x51] sm:$0xff] %v616_v4  ;;  %v556_v7 = vadd.f32 %v2770_v6, %v4032_v45  ;;  %v550_v8 = vpop.f32.mrb[9].mxu0 }
 0x1c8   : > { %635 = vst [vmem:[#allocation2 + $0x49] sm:$0xff] %v615_v5  ;;  %v551_v9 = vadd.f32 %v4032_v45, %v550_v8 }
 0x1c9   : > { %v618_v10 = vmax.f32 %v556_v7, 0.0 }
 0x1ca   : > { %v617_v11 = vmax.f32 %v551_v9, 0.0  ;;  %v2773_v12 = vpop.f32.mrb[10].mxu0 }
 0x1cb   : > { %638 = vst [vmem:[#allocation2 + $0x69] sm:$0xff] %v618_v10  ;;  %v566_v13 = vadd.f32 %v2773_v12, %v4032_v45  ;;  %v560_v14 = vpop.f32.mrb[11].mxu0 }
 0x1cc   : > { %637 = vst [vmem:[#allocation2 + $0x61] sm:$0xff] %v617_v11  ;;  %v561_v15 = vadd.f32 %v4032_v45, %v560_v14 }
 0x1cd   : > { %v620_v16 = vmax.f32 %v566_v13, 0.0 }
 0x1ce   : > { %v619_v17 = vmax.f32 %v561_v15, 0.0  ;;  %v2776_v18 = vpop.f32.mrb[12].mxu0 }
 0x1cf   : > { %640 = vst [vmem:[#allocation2 + $0x81] sm:$0xff] %v620_v16  ;;  %v576_v19 = vadd.f32 %v2776_v18, %v4032_v45  ;;  %v570_v20 = vpop.f32.mrb[13].mxu0 }
 0x1d0   : > { %639 = vst [vmem:[#allocation2 + $0x79] sm:$0xff] %v619_v17  ;;  %v571_v21 = vadd.f32 %v4032_v45, %v570_v20 }
 0x1d1   : > { %v622_v22 = vmax.f32 %v576_v19, 0.0 }
 0x1d2   : > { %v621_v23 = vmax.f32 %v571_v21, 0.0  ;;  %v2779_v24 = vpop.f32.mrb[14].mxu0 }
 0x1d3   : > { %642 = vst [vmem:[#allocation2 + $0x99] sm:$0xff] %v622_v22  ;;  %v586_v25 = vadd.f32 %v2779_v24, %v4032_v45  ;;  %v580_v26 = vpop.f32.mrb[15].mxu0 }
 0x1d4   : > { %641 = vst [vmem:[#allocation2 + $0x91] sm:$0xff] %v621_v23  ;;  %v581_v43 = vadd.f32 %v4032_v45, %v580_v26 }
 0x1d5   : > { %v624_v44 = vmax.f32 %v586_v25, 0.0 }
 0x1d6   : > { %v623_v46 = vmax.f32 %v581_v43, 0.0  ;;  %v2782_v47 = vpop.f32.mrb[16].mxu0 }
 0x1d7   : > { %644 = vst [vmem:[#allocation2 + $0xb1] sm:$0xff] %v624_v44  ;;  %v596_v48 = vadd.f32 %v2782_v47, %v4032_v45  ;;  %v590_v49 = vpop.f32.mrb[17].mxu0 }
 0x1d8   : > { %643 = vst [vmem:[#allocation2 + $0xa9] sm:$0xff] %v623_v46  ;;  %v591_v50 = vadd.f32 %v4032_v45, %v590_v49 }
 0x1d9   : > { %v626_v51 = vmax.f32 %v596_v48, 0.0 }
 0x1da   : > { %v625_v52 = vmax.f32 %v591_v50, 0.0  ;;  %v2785_v53 = vpop.f32.mrb[18].mxu0  ;;  %672 = sbr.rel (%p2260_p6) target bundleno = 481 (0x1e1), region = 76 }
 0x1db   : > { %646 = vst [vmem:[#allocation2 + $0xc9] sm:$0xff] %v626_v51  ;;  %v606_v54 = vadd.f32 %v2785_v53, %v4032_v45  ;;  %v600_v55 = vpop.f32.mrb[19].mxu0 }
 0x1dc   : > { %645 = vst [vmem:[#allocation2 + $0xc1] sm:$0xff] %v625_v52  ;;  %v601_v56 = vadd.f32 %v4032_v45, %v600_v55 }
 0x1dd   : > { %v628_v57 = vmax.f32 %v606_v54, 0.0 }
 0x1de   : > { %v627_v58 = vmax.f32 %v601_v56, 0.0 }
 0x1df   : > { %648 = vst [vmem:[#allocation2 + $0xe1] sm:$0xff] %v628_v57 }
 0x1e0   : > { %647 = vst [vmem:[#allocation2 + $0xd9] sm:$0xff] %v627_v58 }
 0x1e1 PF: > { %s4605_s9 = sld [smem:[#allocation18_spill]] }
 0x1e7   : > { %p2261_p10 = scmp.ne.s32.totalorder %s4605_s9, 1 }
 0x1e8   : > { %v3631_v60 = vmov (!%p2261_p10), 0.0  }
 0x1e9   : > { %679 = sbr.rel (%p2261_p10) target bundleno = 496 (0x1f0), region = 80  ;;  %681 = vst [vmem:[#allocation2 + $0xd8] sm:$0xff] (!%p2261_p10), %v3631_v60  ;;  %682 = vst [vmem:[#allocation2 + $0xe0] sm:$0xff] (!%p2261_p10), %v3631_v60 }
 0x1ea   : > { %683 = vst [vmem:[#allocation2 + $0xe8] sm:$0x3] (!%p2261_p10), %v3631_v60 }
 0x1f0 PF: > { %v846_v45 = vld [vmem:[#allocation8 + $0x80] sm:$0xff]  ;;  %v847_v61 = vld [vmem:[#allocation8 + $0x88] sm:$0xff]  ;;  %v848_v7 = vld [vmem:[#allocation8 + $0x90] sm:$0xff]  ;;  %s4606_s5 = sld [smem:[#allocation25_spill]]  ;;  %s4609_s27 = sld [smem:[#allocation27_spill]] }
 0x1f1   : > { %v830_v62 = vld [vmem:[#allocation8] sm:$0xff]  ;;  %v2986_v63 = vpack.c.bf16 %v847_v61, %v846_v45  ;;  %v831_v0 = vld [vmem:[#allocation8 + $0x8] sm:$0xff]  ;;  %v849_v9 = vld [vmem:[#allocation8 + $0x98] sm:$0xff]  ;;  %s4610_s21 = sld [smem:[#allocation18_spill]]  ;;  %s4611_s26 = sld [smem:[#allocation19_spill]] }
 0x1f2   : > { %v878_v1 = vld [vmem:[#allocation8 + $0x180] sm:$0xff]  ;;  %v879_v2 = vld [vmem:[#allocation8 + $0x188] sm:$0xff]  ;;  %v2988_v3 = vpack.c.bf16 %v831_v0, %v830_v62  ;;  %v832_v10 = vld [vmem:[#allocation8 + $0x10] sm:$0xff]  ;;  %v2990_v12 = vpack.c.bf16 %v849_v9, %v848_v7  ;;  %s2116_s19 = sshll.u32 %s4056_s4, 4  ;;  %s4612_s16 = sld [smem:[#allocation28_spill]]  ;;  %s4496_s19 = int_to_ptr.vmem [resolvable:$true] %s2116_s19 }
 0x1f3   : > { %v3018_v4 = vpack.c.bf16 %v879_v2, %v878_v1  ;;  %v862_v5 = vld [vmem:[#allocation8 + $0x100] sm:$0xff]  ;;  %v863_v6 = vld [vmem:[#allocation8 + $0x108] sm:$0xff]  ;;  %2987 = vmatprep.subr.bf16.mxu1 %v2986_v63  ;;  %v833_v11 = vld [vmem:[#allocation8 + $0x18] sm:$0xff]  ;;  %s2100_s14 = scalar_lea.sflag [#allocation5], %s3942_s23  ;;  %s3514_s1 = scalar_lea.vmem %s4496_s19, 2048 }
 0x1f4   : > { %v3020_v8 = vpack.c.bf16 %v863_v6, %v862_v5  ;;  %2989 = vmatpush3.bf16.msra.mxu1 %v2988_v3  ;;  %v2992_v13 = vpack.c.bf16 %v833_v11, %v832_v10  ;;  %v880_v14 = vld [vmem:[#allocation8 + $0x190] sm:$0xff]  ;;  %v881_v15 = vld [vmem:[#allocation8 + $0x198] sm:$0xff]  ;;  %v850_v19 = vld [vmem:[#allocation8 + $0xa0] sm:$0xff]  ;;  %p3515_p0 = scmp.ne.s32.totalorder %s4496_s19, %s3514_s1 }
 0x1f5   : > { %3019 = vmatprep.subr.bf16.mxu0 %v3018_v4  ;;  %v864_v16 = vld [vmem:[#allocation8 + $0x110] sm:$0xff]  ;;  %v3022_v17 = vpack.c.bf16 %v881_v15, %v880_v14  ;;  %v865_v18 = vld [vmem:[#allocation8 + $0x118] sm:$0xff]  ;;  %v851_v20 = vld [vmem:[#allocation8 + $0xa8] sm:$0xff]  ;;  %2991 = vmatprep.subr.bf16.mxu1 %v2990_v12 }
 0x1f6   : > { %3021 = vmatpush3.bf16.msra.mxu0 %v3020_v8  ;;  %v3024_v21 = vpack.c.bf16 %v865_v18, %v864_v16  ;;  %v2994_v22 = vpack.c.bf16 %v851_v20, %v850_v19  ;;  %v834_v23 = vld [vmem:[#allocation8 + $0x20] sm:$0xff]  ;;  %v835_v24 = vld [vmem:[#allocation8 + $0x28] sm:$0xff]  ;;  %v852_v48 = vld [vmem:[#allocation8 + $0xb0] sm:$0xff]  ;;  %p3516_p5 = pnand %p3515_p0, %p3880_p3 }
 0x1f7   : > { %v882_v25 = vld [vmem:[#allocation8 + $0x1a0] sm:$0xff]  ;;  %3023 = vmatprep.subr.bf16.mxu0 %v3022_v17  ;;  %v883_v26 = vld [vmem:[#allocation8 + $0x1a8] sm:$0xff]  ;;  %v2996_v46 = vpack.c.bf16 %v835_v24, %v834_v23  ;;  %v853_v49 = vld [vmem:[#allocation8 + $0xb8] sm:$0xff]  ;;  %s2271_s24 = sshll.u32 %s4610_s21, 4  ;;  %s2267_s13 = sshll.u32 %s4611_s26, 5 }
 0x1f8   : > { %v866_v43 = vld [vmem:[#allocation8 + $0x120] sm:$0xff]  ;;  %v867_v44 = vld [vmem:[#allocation8 + $0x128] sm:$0xff]  ;;  %2993 = vmatpush3.bf16.msra.mxu1 %v2992_v13  ;;  %v3026_v47 = vpack.c.bf16 %v883_v26, %v882_v25  ;;  %v836_v50 = vld [vmem:[#allocation8 + $0x30] sm:$0xff]  ;;  %v2998_v52 = vpack.c.bf16 %v853_v49, %v852_v48  ;;  %s2113_s7 = sadd.s32 %s2271_s24, %s2267_s13  ;;  %p3517_p7 = pneg %p3516_p5 }
 0x1f9   : > { %2995 = vmatprep.subr.bf16.mxu1 %v2994_v22  ;;  %v3028_v51 = vpack.c.bf16 %v867_v44, %v866_v43  ;;  %v837_v53 = vld [vmem:[#allocation8 + $0x38] sm:$0xff]  ;;  %v884_v54 = vld [vmem:[#allocation8 + $0x1b0] sm:$0xff]  ;;  %v854_v59 = vld [vmem:[#allocation8 + $0xc0] sm:$0xff]  ;;  %s2268_s3 = sshll.u32 %s2113_s7, 7 }
 0x1fa   : > { %3025 = vmatpush3.bf16.msra.mxu0 %v3024_v21  ;;  %v885_v55 = vld [vmem:[#allocation8 + $0x1b8] sm:$0xff]  ;;  %v868_v57 = vld [vmem:[#allocation8 + $0x130] sm:$0xff]  ;;  %v855_v60 = vld [vmem:[#allocation8 + $0xc8] sm:$0xff]  ;;  %v3000_v45 = vpack.c.bf16 %v837_v53, %v836_v50  ;;  %s4494_s9 = scalar_lea.hbm %s4612_s16, %s2268_s3 }
 0x1fb   : > { %3027 = vmatprep.subr.bf16.mxu0 %v3026_v47  ;;  %v3030_v56 = vpack.c.bf16 %v885_v55, %v884_v54  ;;  %v869_v58 = vld [vmem:[#allocation8 + $0x138] sm:$0xff]  ;;  %v886_v61 = vld [vmem:[#allocation8 + $0x1c0] sm:$0xff]  ;;  %v887_v62 = vld [vmem:[#allocation8 + $0x1c8] sm:$0xff]  ;;  %v3002_v0 = vpack.c.bf16 %v855_v60, %v854_v59 }
 0x1fc   : > { %2997 = vmatpush3.bf16.msra.mxu1 %v2996_v46  ;;  %v3032_v63 = vpack.c.bf16 %v869_v58, %v868_v57  ;;  %v838_v1 = vld [vmem:[#allocation8 + $0x40] sm:$0xff]  ;;  %v839_v2 = vld [vmem:[#allocation8 + $0x48] sm:$0xff]  ;;  %v3034_v4 = vpack.c.bf16 %v887_v62, %v886_v61  ;;  %v856_v6 = vld [vmem:[#allocation8 + $0xd0] sm:$0xff] }
 0x1fd   : > { %2999 = vmatprep.subr.bf16.mxu1 %v2998_v52  ;;  %v870_v3 = vld [vmem:[#allocation8 + $0x140] sm:$0xff]  ;;  %v871_v5 = vld [vmem:[#allocation8 + $0x148] sm:$0xff]  ;;  %v857_v7 = vld [vmem:[#allocation8 + $0xd8] sm:$0xff]  ;;  %v3004_v10 = vpack.c.bf16 %v839_v2, %v838_v1 }
 0x1fe   : > { %3029 = vmatpush3.bf16.msra.mxu0 %v3028_v51  ;;  %v888_v8 = vld [vmem:[#allocation8 + $0x1d0] sm:$0xff]  ;;  %v889_v9 = vld [vmem:[#allocation8 + $0x1d8] sm:$0xff]  ;;  %v3036_v11 = vpack.c.bf16 %v871_v5, %v870_v3  ;;  %v3006_v12 = vpack.c.bf16 %v857_v7, %v856_v6  ;;  %v858_v18 = vld [vmem:[#allocation8 + $0xe0] sm:$0xff] }
 0x1ff   : > { %3031 = vmatprep.subr.bf16.mxu0 %v3030_v56  ;;  %v840_v13 = vld [vmem:[#allocation8 + $0x50] sm:$0xff]  ;;  %v841_v14 = vld [vmem:[#allocation8 + $0x58] sm:$0xff]  ;;  %v3038_v16 = vpack.c.bf16 %v889_v9, %v888_v8  ;;  %v859_v19 = vld [vmem:[#allocation8 + $0xe8] sm:$0xff] }
 0x200   : > { %3001 = vmatpush3.bf16.msra.mxu1 %v3000_v45  ;;  %v872_v15 = vld [vmem:[#allocation8 + $0x150] sm:$0xff]  ;;  %v873_v17 = vld [vmem:[#allocation8 + $0x158] sm:$0xff]  ;;  %v890_v20 = vld [vmem:[#allocation8 + $0x1e0] sm:$0xff]  ;;  %v3008_v22 = vpack.c.bf16 %v841_v14, %v840_v13  ;;  %v3010_v26 = vpack.c.bf16 %v859_v19, %v858_v18 }
 0x201   : > { %3003 = vmatprep.subr.bf16.mxu1 %v3002_v0  ;;  %v891_v21 = vld [vmem:[#allocation8 + $0x1e8] sm:$0xff]  ;;  %v842_v23 = vld [vmem:[#allocation8 + $0x60] sm:$0xff]  ;;  %v700_v24 = vld [vmem:[#allocation2 + $0x1] sm:$0xff]  ;;  %v3040_v25 = vpack.c.bf16 %v873_v17, %v872_v15 }
 0x202   : > { %3033 = vmatpush3.bf16.msra.mxu0 %v3032_v63  ;;  %v843_v43 = vld [vmem:[#allocation8 + $0x68] sm:$0xff]  ;;  %v874_v44 = vld [vmem:[#allocation8 + $0x160] sm:$0xff]  ;;  %v3042_v47 = vpack.c.bf16 %v891_v21, %v890_v20  ;;  %v860_v48 = vld [vmem:[#allocation8 + $0xf0] sm:$0xff]  ;;  %1045 = vmatprep.mubr.f32.mxu1 %v700_v24 }
 0x203   : > { %3035 = vmatprep.subr.bf16.mxu0 %v3034_v4  ;;  %v875_v46 = vld [vmem:[#allocation8 + $0x168] sm:$0xff]  ;;  %v861_v49 = vld [vmem:[#allocation8 + $0xf8] sm:$0xff]  ;;  %v892_v51 = vld [vmem:[#allocation8 + $0x1f0] sm:$0xff]  ;;  %v3012_v53 = vpack.c.bf16 %v843_v43, %v842_v23 }
 0x204   : > { %3005 = vmatpush3.bf16.msra.mxu1 %v3004_v10  ;;  %v4060_v50 = vld [vmem:[#allocation2 + $0x18] sm:$0xff]  ;;  %v893_v52 = vld [vmem:[#allocation8 + $0x1f8] sm:$0xff]  ;;  %v3044_v54 = vpack.c.bf16 %v875_v46, %v874_v44  ;;  %v3014_v55 = vpack.c.bf16 %v861_v49, %v860_v48  ;;  %v844_v56 = vld [vmem:[#allocation8 + $0x70] sm:$0xff] }
 0x205   : > { %3007 = vmatprep.subr.bf16.mxu1 %v3006_v12  ;;  %1190 = vmatprep.mubr.f32.mxu0 %v4060_v50  ;;  %v845_v57 = vld [vmem:[#allocation8 + $0x78] sm:$0xff]  ;;  %v876_v58 = vld [vmem:[#allocation8 + $0x170] sm:$0xff]  ;;  %v3046_v59 = vpack.c.bf16 %v893_v52, %v892_v51  ;;  %v910_v45 = vld [vmem:[#allocation8 + $0x280] sm:$0xff] }
 0x206   : > { %3037 = vmatpush3.bf16.msra.mxu0 %v3036_v11  ;;  %v877_v60 = vld [vmem:[#allocation8 + $0x178] sm:$0xff]  ;;  %v911_v61 = vld [vmem:[#allocation8 + $0x288] sm:$0xff]  ;;  %v3016_v62 = vpack.c.bf16 %v845_v57, %v844_v56  ;;  %v894_v1 = vld [vmem:[#allocation8 + $0x200] sm:$0xff] }
 0x207   : > { %3039 = vmatprep.subr.bf16.mxu0 %v3038_v16  ;;  %v3048_v63 = vpack.c.bf16 %v877_v60, %v876_v58  ;;  %v3050_v0 = vpack.c.bf16 %v911_v61, %v910_v45  ;;  %v895_v2 = vld [vmem:[#allocation8 + $0x208] sm:$0xff]  ;;  %v912_v3 = vld [vmem:[#allocation8 + $0x290] sm:$0xff]  ;;  %v913_v4 = vld [vmem:[#allocation8 + $0x298] sm:$0xff] }
 0x208   : > { %3009 = vmatpush3.bf16.msra.mxu1 %v3008_v22  ;;  %v684_v5 = vld [vmem:[#allocation2] sm:$0xff]  ;;  %v3052_v6 = vpack.c.bf16 %v895_v2, %v894_v1  ;;  %v701_v8 = vld [vmem:[#allocation2 + $0x9] sm:$0xff]  ;;  %v3054_v10 = vpack.c.bf16 %v913_v4, %v912_v3  ;;  %v915_v14 = vld [vmem:[#allocation8 + $0x2a8] sm:$0xff] }
 0x209   : > { %3011 = vmatprep.subr.bf16.mxu1 %v3010_v26  ;;  %v716_v7 = vld [vmem:[#allocation2 + $0x2] sm:$0xff]  ;;  %v914_v13 = vld [vmem:[#allocation8 + $0x2a0] sm:$0xff]  ;;  %v943_v16 = vld [vmem:[#allocation8 + $0x388] sm:$0xff] }
 0x20a   : > { %3041 = vmatpush3.bf16.msra.mxu0 %v3040_v25  ;;  %v4063_v9 = vld [vmem:[#allocation2 + $0x20] sm:$0xff]  ;;  %v897_v12 = vld [vmem:[#allocation8 + $0x218] sm:$0xff]  ;;  %v942_v15 = vld [vmem:[#allocation8 + $0x380] sm:$0xff]  ;;  %v3058_v26 = vpack.c.bf16 %v915_v14, %v914_v13 }
 0x20b   : > { %3043 = vmatprep.subr.bf16.mxu0 %v3042_v47  ;;  %v896_v11 = vld [vmem:[#allocation8 + $0x210] sm:$0xff]  ;;  %v685_v17 = vld [vmem:[#allocation2 + $0x8] sm:$0xff]  ;;  %v3082_v18 = vpack.c.bf16 %v943_v16, %v942_v15  ;;  %v926_v19 = vld [vmem:[#allocation8 + $0x300] sm:$0xff] }
 0x20c   : > { %3013 = vmatpush3.bf16.msra.mxu1 %v3012_v53  ;;  %v927_v20 = vld [vmem:[#allocation8 + $0x308] sm:$0xff]  ;;  %v717_v21 = vld [vmem:[#allocation2 + $0xa] sm:$0xff]  ;;  %v3056_v23 = vpack.c.bf16 %v897_v12, %v896_v11  ;;  %v916_v46 = vld [vmem:[#allocation8 + $0x2b0] sm:$0xff] }
 0x20d   : > { %3015 = vmatprep.subr.bf16.mxu1 %v3014_v55  ;;  %v4066_v22 = vld [vmem:[#allocation2 + $0x19] sm:$0xff]  ;;  %v3084_v24 = vpack.c.bf16 %v927_v20, %v926_v19  ;;  %v4068_v25 = vld [vmem:[#allocation2 + $0x30] sm:$0xff]  ;;  %v917_v47 = vld [vmem:[#allocation8 + $0x2b8] sm:$0xff] }
 0x20e   : > { %3045 = vmatpush3.bf16.msra.mxu0 %v3044_v54  ;;  %v898_v43 = vld [vmem:[#allocation8 + $0x220] sm:$0xff]  ;;  %v899_v44 = vld [vmem:[#allocation8 + $0x228] sm:$0xff]  ;;  %v944_v48 = vld [vmem:[#allocation8 + $0x390] sm:$0xff]  ;;  %v3062_v58 = vpack.c.bf16 %v917_v47, %v916_v46 }
 0x20f   : > { %3047 = vmatprep.subr.bf16.mxu0 %v3046_v59  ;;  %v945_v49 = vld [vmem:[#allocation8 + $0x398] sm:$0xff]  ;;  %v928_v51 = vld [vmem:[#allocation8 + $0x310] sm:$0xff]  ;;  %v3060_v54 = vpack.c.bf16 %v899_v44, %v898_v43  ;;  %v4076_v57 = vld [vmem:[#allocation2 + $0x38] sm:$0xff] }
 0x210   : > { %3017 = vmatpush3.bf16.msra.mxu1 %v3016_v62  ;;  %v4072_v52 = vld [vmem:[#allocation2 + $0x1a] sm:$0xff]  ;;  %v3086_v55 = vpack.c.bf16 %v945_v49, %v944_v48  ;;  %v929_v56 = vld [vmem:[#allocation8 + $0x318] sm:$0xff]  ;;  %v4081_v62 = vld [vmem:[#allocation2 + $0x31] sm:$0xff] }
 0x211   : > { %3051 = vmatprep.subr.bf16.mxu1 %v3050_v0  ;;  %v4074_v53 = vld [vmem:[#allocation2 + $0x21] sm:$0xff]  ;;  %v3088_v45 = vpack.c.bf16 %v929_v56, %v928_v51  ;;  %v919_v0 = vld [vmem:[#allocation8 + $0x2c8] sm:$0xff]  ;;  %v946_v1 = vld [vmem:[#allocation8 + $0x3a0] sm:$0xff] }
 0x212   : > { %3049 = vmatpush3.bf16.msra.mxu0 %v3048_v63  ;;  %v900_v59 = vld [vmem:[#allocation8 + $0x230] sm:$0xff]  ;;  %v901_v60 = vld [vmem:[#allocation8 + $0x238] sm:$0xff]  ;;  %v918_v63 = vld [vmem:[#allocation8 + $0x2c0] sm:$0xff] }
 0x213   : > { %1046 = vmatmul.mubr.f32.vlgmr.msra.gmra.mrb[0].mxu1 %v684_v5  ;;  %3083 = vmatprep.subr.bf16.mxu0 %v3082_v18  ;;  %v4079_v61 = vld [vmem:[#allocation2 + $0x22] sm:$0xff]  ;;  %v947_v3 = vld [vmem:[#allocation8 + $0x3a8] sm:$0xff]  ;;  %v930_v4 = vld [vmem:[#allocation8 + $0x320] sm:$0xff] }
 0x214   : > { %3053 = vmatpush3.bf16.msra.mxu1 %v3052_v6  ;;  %1050 = vmatprep.mubr.f32.mxu1 %v701_v8  ;;  %v4085_v2 = vld [vmem:[#allocation2 + $0x48] sm:$0xff]  ;;  %v902_v5 = vld [vmem:[#allocation8 + $0x240] sm:$0xff]  ;;  %v903_v6 = vld [vmem:[#allocation8 + $0x248] sm:$0xff] }
 0x215   : > { %1191 = vmatmul.mubr.f32.vlgmr.msra.gmra.mrb[20].mxu0 %v716_v7  ;;  %3055 = vmatprep.subr.bf16.mxu1 %v3054_v10  ;;  %v3090_v7 = vpack.c.bf16 %v947_v3, %v946_v1  ;;  %v931_v8 = vld [vmem:[#allocation8 + $0x328] sm:$0xff]  ;;  %v3066_v10 = vpack.c.bf16 %v919_v0, %v918_v63  ;;  %v920_v11 = vld [vmem:[#allocation8 + $0x2d0] sm:$0xff]  ;;  %v949_v14 = vld [vmem:[#allocation8 + $0x3b8] sm:$0xff] }
 0x216   : > { %1195 = vmatprep.mubr.f32.mxu0 %v4063_v9  ;;  %3085 = vmatpush3.bf16.msra.mxu0 %v3084_v24  ;;  %v3092_v12 = vpack.c.bf16 %v931_v8, %v930_v4  ;;  %v948_v13 = vld [vmem:[#allocation8 + $0x3b0] sm:$0xff]  ;;  %v921_v15 = vld [vmem:[#allocation8 + $0x2d8] sm:$0xff]  ;;  %v4091_v19 = vld [vmem:[#allocation2 + $0x32] sm:$0xff] }
 0x217   : > { %1051 = vmatmul.mubr.f32.gmra.mrb[2].mxu1 %v685_v17  ;;  %3087 = vmatprep.subr.bf16.mxu0 %v3086_v55  ;;  %v3094_v16 = vpack.c.bf16 %v949_v14, %v948_v13  ;;  %v932_v17 = vld [vmem:[#allocation8 + $0x330] sm:$0xff]  ;;  %v933_v18 = vld [vmem:[#allocation8 + $0x338] sm:$0xff]  ;;  %v950_v24 = vld [vmem:[#allocation8 + $0x3c0] sm:$0xff] }
 0x218   : > { %1055 = vmatprep.mubr.f32.mxu1 %v4066_v22  ;;  %3057 = vmatpush3.bf16.msra.mxu1 %v3056_v23  ;;  %v4093_v20 = vld [vmem:[#allocation2 + $0x39] sm:$0xff]  ;;  %v3068_v23 = vpack.c.bf16 %v903_v6, %v902_v5  ;;  %v905_v43 = vld [vmem:[#allocation8 + $0x258] sm:$0xff]  ;;  %v3096_v44 = vpack.c.bf16 %v933_v18, %v932_v17  ;;  %v922_v46 = vld [vmem:[#allocation8 + $0x2e0] sm:$0xff] }
 0x219   : > { %1196 = vmatmul.mubr.f32.gmra.mrb[22].mxu0 %v717_v21  ;;  %3059 = vmatprep.subr.bf16.mxu1 %v3058_v26  ;;  %v4096_v21 = vld [vmem:[#allocation2 + $0x50] sm:$0xff]  ;;  %v3070_v26 = vpack.c.bf16 %v921_v15, %v920_v11  ;;  %v951_v47 = vld [vmem:[#allocation8 + $0x3c8] sm:$0xff]  ;;  %v952_v55 = vld [vmem:[#allocation8 + $0x3d0] sm:$0xff] }
 0x21a   : > { %1200 = vmatprep.mubr.f32.mxu0 %v4068_v25  ;;  %3089 = vmatpush3.bf16.msra.mxu0 %v3088_v45  ;;  %v923_v48 = vld [vmem:[#allocation8 + $0x2e8] sm:$0xff]  ;;  %v3098_v49 = vpack.c.bf16 %v951_v47, %v950_v24  ;;  %v934_v51 = vld [vmem:[#allocation8 + $0x340] sm:$0xff]  ;;  %v953_v56 = vld [vmem:[#allocation8 + $0x3d8] sm:$0xff] }
 0x21b   : > { %1056 = vmatmul.mubr.f32.gmra.mrb[4].mxu1 %v4060_v50  ;;  %v3064_v50 = vpack.c.bf16 %v901_v60, %v900_v59  ;;  %3091 = vmatprep.subr.bf16.mxu0 %v3090_v7  ;;  %v4104_v59 = vld [vmem:[#allocation2 + $0x49] sm:$0xff]  ;;  %v4106_v60 = vld [vmem:[#allocation2 + $0x60] sm:$0xff]  ;;  %v3074_v63 = vpack.c.bf16 %v923_v48, %v922_v46  ;;  %v907_v1 = vld [vmem:[#allocation8 + $0x268] sm:$0xff] }
 0x21c   : > { %1060 = vmatprep.mubr.f32.mxu1 %v4074_v53  ;;  %3061 = vmatpush3.bf16.msra.mxu1 %v3060_v54  ;;  %v935_v54 = vld [vmem:[#allocation8 + $0x348] sm:$0xff]  ;;  %v906_v0 = vld [vmem:[#allocation8 + $0x260] sm:$0xff]  ;;  %v936_v4 = vld [vmem:[#allocation8 + $0x350] sm:$0xff] }
 0x21d   : > { %1201 = vmatmul.mubr.f32.gmra.mrb[24].mxu0 %v4072_v52  ;;  %3063 = vmatprep.subr.bf16.mxu1 %v3062_v58  ;;  %v4102_v58 = vld [vmem:[#allocation2 + $0x3a] sm:$0xff]  ;;  %v3100_v3 = vpack.c.bf16 %v935_v54, %v934_v51  ;;  %v937_v5 = vld [vmem:[#allocation8 + $0x358] sm:$0xff]  ;;  %v954_v8 = vld [vmem:[#allocation8 + $0x3e0] sm:$0xff]  ;;  %v3076_v14 = vpack.c.bf16 %v907_v1, %v906_v0 }
 0x21e   : > { %1205 = vmatprep.mubr.f32.mxu0 %v4076_v57  ;;  %3093 = vmatpush3.bf16.msra.mxu0 %v3092_v12  ;;  %v924_v6 = vld [vmem:[#allocation8 + $0x2f0] sm:$0xff]  ;;  %v925_v7 = vld [vmem:[#allocation8 + $0x2f8] sm:$0xff]  ;;  %v4114_v12 = vld [vmem:[#allocation2 + $0x51] sm:$0xff]  ;;  %v3104_v15 = vpack.c.bf16 %v937_v5, %v936_v4 }
 0x21f   : > { %1061 = vmatmul.mubr.f32.gmra.mrb[6].mxu1 %v4063_v9  ;;  %v904_v9 = vld [vmem:[#allocation8 + $0x250] sm:$0xff]  ;;  %3095 = vmatprep.subr.bf16.mxu0 %v3094_v16  ;;  %v4112_v11 = vld [vmem:[#allocation2 + $0x4a] sm:$0xff]  ;;  %v3078_v16 = vpack.c.bf16 %v925_v7, %v924_v6  ;;  %v939_v24 = vld [vmem:[#allocation8 + $0x368] sm:$0xff] }
 0x220   : > { %1065 = vmatprep.mubr.f32.mxu1 %v4081_v62  ;;  %3065 = vmatpush3.bf16.msra.mxu1 %v3064_v50  ;;  %v3072_v45 = vpack.c.bf16 %v905_v43, %v904_v9  ;;  %v3102_v50 = vpack.c.bf16 %v953_v56, %v952_v55  ;;  %v4116_v13 = vld [vmem:[#allocation2 + $0x68] sm:$0xff]  ;;  %v908_v17 = vld [vmem:[#allocation8 + $0x270] sm:$0xff]  ;;  %v959_v43 = vld [vmem:[#allocation8 + $0x408] sm:$0xff] }
 0x221   : > { %1206 = vmatmul.mubr.f32.gmra.mrb[26].mxu0 %v4079_v61  ;;  %3067 = vmatprep.subr.bf16.mxu1 %v3066_v10  ;;  %v955_v10 = vld [vmem:[#allocation8 + $0x3e8] sm:$0xff]  ;;  %v909_v18 = vld [vmem:[#allocation8 + $0x278] sm:$0xff]  ;;  %v4149_v6 = vld [vmem:[#allocation2 + $0x90] sm:$0xff] }
 0x222   : > { %1210 = vmatprep.mubr.f32.mxu0 %v4085_v2  ;;  %3097 = vmatpush3.bf16.msra.mxu0 %v3096_v44  ;;  %v3106_v9 = vpack.c.bf16 %v955_v10, %v954_v8  ;;  %v956_v44 = vld [vmem:[#allocation8 + $0x3f0] sm:$0xff]  ;;  %v957_v46 = vld [vmem:[#allocation8 + $0x3f8] sm:$0xff]  ;;  %v4122_v47 = vld [vmem:[#allocation2 + $0x52] sm:$0xff] }
 0x223   : > { %1066 = vmatmul.mubr.f32.gmra.mrb[8].mxu1 %v4068_v25  ;;  %3099 = vmatprep.subr.bf16.mxu0 %v3098_v49  ;;  %v4124_v48 = vld [vmem:[#allocation2 + $0x61] sm:$0xff]  ;;  %v3080_v49 = vpack.c.bf16 %v909_v18, %v908_v17  ;;  %v4126_v51 = vld [vmem:[#allocation2 + $0x78] sm:$0xff]  ;;  %v3110_v56 = vpack.c.bf16 %v957_v46, %v956_v44  ;;  %v4136_v1 = vld [vmem:[#allocation2 + $0x69] sm:$0xff] }
 0x224   : > { %1070 = vmatprep.mubr.f32.mxu1 %v4093_v20  ;;  %3069 = vmatpush3.bf16.msra.mxu1 %v3068_v23  ;;  %v938_v23 = vld [vmem:[#allocation8 + $0x360] sm:$0xff]  ;;  %v4134_v0 = vld [vmem:[#allocation2 + $0x62] sm:$0xff]  ;;  %v4147_v5 = vld [vmem:[#allocation2 + $0x79] sm:$0xff] }
 0x225   : > { %1211 = vmatmul.mubr.f32.gmra.mrb[28].mxu0 %v4091_v19  ;;  %3071 = vmatprep.subr.bf16.mxu1 %v3070_v26  ;;  %v958_v26 = vld [vmem:[#allocation8 + $0x400] sm:$0xff]  ;;  %v3108_v54 = vpack.c.bf16 %v939_v24, %v938_v23  ;;  %v4155_v7 = vld [vmem:[#allocation2 + $0x7a] sm:$0xff]  ;;  %v4199_v46 = vld [vmem:[#allocation2 + $0xc8] sm:$0xff] }
 0x226   : > { %1215 = vmatprep.mubr.f32.mxu0 %v4096_v21  ;;  %3101 = vmatpush3.bf16.msra.mxu0 %v3100_v3  ;;  %v4128_v55 = vpack.c.bf16 %v959_v43, %v958_v26  ;;  %v4138_v3 = vld [vmem:[#allocation2 + $0x80] sm:$0xff]  ;;  %v4159_v10 = vld [vmem:[#allocation2 + $0x98] sm:$0xff]  ;;  %v4179_v23 = vld [vmem:[#allocation2 + $0xb0] sm:$0xff] }
 0x227   : > { %1071 = vmatmul.mubr.f32.gmra.mrb[10].mxu1 %v4076_v57  ;;  %3103 = vmatprep.subr.bf16.mxu0 %v3102_v50  ;;  %v4145_v50 = vld [vmem:[#allocation2 + $0x6a] sm:$0xff]  ;;  %v4157_v8 = vld [vmem:[#allocation2 + $0x81] sm:$0xff]  ;;  %v4175_v17 = vld [vmem:[#allocation2 + $0x92] sm:$0xff] }
 0x228   : > { %1075 = vmatprep.mubr.f32.mxu1 %v4104_v59  ;;  %3073 = vmatpush3.bf16.msra.mxu1 %v3072_v45  ;;  %v940_v45 = vld [vmem:[#allocation8 + $0x370] sm:$0xff]  ;;  %v4187_v24 = vld [vmem:[#allocation2 + $0xa9] sm:$0xff]  ;;  %v4197_v44 = vld [vmem:[#allocation2 + $0xb1] sm:$0xff] }
 0x229   : > { %1216 = vmatmul.mubr.f32.gmra.mrb[30].mxu0 %v4102_v58  ;;  %3075 = vmatprep.subr.bf16.mxu1 %v3074_v63  ;;  %v941_v63 = vld [vmem:[#allocation8 + $0x378] sm:$0xff]  ;;  %v4177_v18 = vld [vmem:[#allocation2 + $0x99] sm:$0xff] }
 0x22a   : > { %1220 = vmatprep.mubr.f32.mxu0 %v4106_v60  ;;  %3105 = vmatpush3.bf16.msra.mxu0 %v3104_v15  ;;  %v3112_v4 = vpack.c.bf16 %v941_v63, %v940_v45  ;;  %v4167_v15 = vld [vmem:[#allocation2 + $0x91] sm:$0xff]  ;;  %v4189_v26 = vld [vmem:[#allocation2 + $0xc0] sm:$0xff]  ;;  %v965_v41 = vld [vmem:[#allocation8 + $0x438] sm:$0xff] }
 0x22b   : > { %1076 = vmatmul.mubr.f32.gmra.mrb[12].mxu1 %v4085_v2  ;;  %3107 = vmatprep.subr.bf16.mxu0 %v3106_v9  ;;  %v4185_v9 = vld [vmem:[#allocation2 + $0x9a] sm:$0xff]  ;;  %v4195_v43 = vld [vmem:[#allocation2 + $0xaa] sm:$0xff] }
 0x22c   : > { %1080 = vmatprep.mubr.f32.mxu1 %v4114_v12  ;;  %3077 = vmatpush3.bf16.msra.mxu1 %v3076_v14  ;;  %v4165_v14 = vld [vmem:[#allocation2 + $0x82] sm:$0xff]  ;;  %v962_v63 = vld [vmem:[#allocation8 + $0x420] sm:$0xff] }
 0x22d   : > { %1221 = vmatmul.mubr.f32.gmra.mrb[32].mxu0 %v4112_v11  ;;  %3079 = vmatprep.subr.bf16.mxu1 %v3078_v16  ;;  %v4169_v16 = vld [vmem:[#allocation2 + $0xa8] sm:$0xff] }
 0x22e   : > { %1225 = vmatprep.mubr.f32.mxu0 %v4116_v13  ;;  %3109 = vmatpush3.bf16.msra.mxu0 %v3108_v54  ;;  %v960_v54 = vld [vmem:[#allocation8 + $0x410] sm:$0xff] }
 0x22f   : > { %1081 = vmatmul.mubr.f32.gmra.mrb[14].mxu1 %v4096_v21  ;;  %3111 = vmatprep.subr.bf16.mxu0 %v3110_v56  ;;  %v961_v56 = vld [vmem:[#allocation8 + $0x418] sm:$0xff] }
 0x230   : > { %1085 = vmatprep.mubr.f32.mxu1 %v4124_v48  ;;  %3081 = vmatpush3.bf16.msra.mxu1 %v3080_v49  ;;  %v4205_v49 = vld [vmem:[#allocation2 + $0xb2] sm:$0xff]  ;;  %v3118_v45 = vpack.c.bf16 %v961_v56, %v960_v54  ;;  %v1745_v54 = vld [vmem:[#allocation11 + $0x38] sm:$0xff] }
 0x231   : > { %1226 = vmatmul.mubr.f32.gmra.mrb[34].mxu0 %v4122_v47  ;;  %3115 = vmatprep.subr.bf16.mxu1 %v4128_v55 }
 0x232   : > { %1230 = vmatprep.mubr.f32.mxu0 %v4126_v51  ;;  %3113 = vmatpush3.bf16.msra.mxu0 %v3112_v4  ;;  %v963_v4 = vld [vmem:[#allocation8 + $0x428] sm:$0xff] }
 0x233   : > { %1086 = vmatmul.mubr.f32.gmra.mrb[16].mxu1 %v4106_v60  ;;  %v3122_v42 = vpack.c.bf16 %v963_v4, %v962_v63  ;;  %v1747_v63 = vld [vmem:[#allocation11 + $0x48] sm:$0xff]  ;;  %v1730_v4 = vld [vmem:[#allocation9 + $0x40] sm:$0xff] }
 0x234   : > { %1090 = vmatprep.mubr.f32.mxu1 %v4136_v1 }
 0x235   : > { %1231 = vmatmul.mubr.f32.gmra.mrb[36].mxu0 %v4134_v0 }
 0x236   : > { %1235 = vmatprep.mubr.f32.mxu0 %v4138_v3 }
 0x237   : > { %1091 = vmatmul.mubr.f32.gmra.mrb[18].mxu1 %v4116_v13 }
 0x238   : > { %1095 = vmatprep.mubr.f32.mxu1 %v4147_v5 }
 0x239   : > { %1236 = vmatmul.mubr.f32.gmra.mrb[38].mxu0 %v4145_v50 }
 0x23a   : > { %1240 = vmatprep.mubr.f32.mxu0 %v4149_v6 }
 0x23b   : > { %1096 = vmatmul.mubr.f32.gmra.mrb[20].mxu1 %v4126_v51 }
 0x23c   : > { %1100 = vmatprep.mubr.f32.mxu1 %v4157_v8 }
 0x23d   : > { %1241 = vmatmul.mubr.f32.gmra.mrb[40].mxu0 %v4155_v7 }
 0x23e   : > { %1245 = vmatprep.mubr.f32.mxu0 %v4159_v10 }
 0x23f   : > { %1101 = vmatmul.mubr.f32.gmra.mrb[22].mxu1 %v4138_v3 }
 0x240   : > { %1105 = vmatprep.mubr.f32.mxu1 %v4167_v15 }
 0x241   : > { %1246 = vmatmul.mubr.f32.gmra.mrb[42].mxu0 %v4165_v14 }
 0x242   : > { %1250 = vmatprep.mubr.f32.mxu0 %v4169_v16 }
 0x243   : > { %1106 = vmatmul.mubr.f32.gmra.mrb[24].mxu1 %v4149_v6 }
 0x244   : > { %1110 = vmatprep.mubr.f32.mxu1 %v4177_v18 }
 0x245   : > { %1251 = vmatmul.mubr.f32.gmra.mrb[44].mxu0 %v4175_v17 }
 0x246   : > { %1255 = vmatprep.mubr.f32.mxu0 %v4179_v23 }
 0x247   : > { %1111 = vmatmul.mubr.f32.gmra.mrb[26].mxu1 %v4159_v10 }
 0x248   : > { %1115 = vmatprep.mubr.f32.mxu1 %v4187_v24 }
 0x249   : > { %1256 = vmatmul.mubr.f32.gmra.mrb[46].mxu0 %v4185_v9 }
 0x24a   : > { %1260 = vmatprep.mubr.f32.mxu0 %v4189_v26 }
 0x24b   : > { %1116 = vmatmul.mubr.f32.gmra.mrb[28].mxu1 %v4169_v16 }
 0x24c   : > { %1120 = vmatprep.mubr.f32.mxu1 %v4197_v44 }
 0x24d   : > { %1261 = vmatmul.mubr.f32.gmra.mrb[48].mxu0 %v4195_v43 }
 0x24e   : > { %1265 = vmatprep.mubr.f32.mxu0 %v4199_v46 }
 0x24f   : > { %1121 = vmatmul.mubr.f32.gmra.mrb[30].mxu1 %v4179_v23 }
 0x250   : > { %1335 = vmatprep.mubr.f32.mxu1 %v4072_v52  ;;  %v964_v52 = vld [vmem:[#allocation8 + $0x430] sm:$0xff] }
 0x251   : > { %1266 = vmatmul.mubr.f32.gmra.mrb[50].mxu0 %v4205_v49 }
 0x252   : > { %1480 = vmatprep.mubr.f32.mxu0 %v4081_v62 }
 0x253   : > { %1336 = vmatmul.mubr.f32.vlgmr.msra.gmra.mrb[32].mxu1 %v4066_v22  ;;  %v3126_v22 = vpack.c.bf16 %v965_v41, %v964_v52  ;;  %v1731_v52 = vld [vmem:[#allocation9 + $0x48] sm:$0xff] }
 0x254   : > { %3117 = vmatpush3.bf16.msra.mxu1 %v4128_v55  ;;  %1340 = vmatprep.mubr.f32.mxu1 %v4079_v61  ;;  %v967_v61 = vld [vmem:[#allocation8 + $0x448] sm:$0xff]  ;;  %v969_v55 = vld [vmem:[#allocation8 + $0x458] sm:$0xff] }
 0x255   : > { %1481 = vmatmul.mubr.f32.vlgmr.msra.gmra.mrb[52].mxu0 %v4068_v25  ;;  %3119 = vmatprep.subr.bf16.mxu1 %v3118_v45  ;;  %v966_v25 = vld [vmem:[#allocation8 + $0x440] sm:$0xff] }
 0x256   : > { %1485 = vmatprep.mubr.f32.mxu0 %v4093_v20 }
 0x257   : > { %1341 = vmatmul.mubr.f32.gmra.mrb[34].mxu1 %v4074_v53  ;;  %v3130_v53 = vpack.c.bf16 %v967_v61, %v966_v25  ;;  %v4293_v25 = vpack.c.bf16 %v1731_v52, %v1730_v4  ;;  %v1748_v61 = vld [vmem:[#allocation11 + $0x50] sm:$0xff] }
 0x258   : > { %1345 = vmatprep.mubr.f32.mxu1 %v4091_v19  ;;  %3121 = vmatpush3.bf16.msra.mxu1 %v3118_v45  ;;  %v1746_v45 = vld [vmem:[#allocation11 + $0x40] sm:$0xff] }
 0x259   : > { %1486 = vmatmul.mubr.f32.gmra.mrb[54].mxu0 %v4076_v57  ;;  %3123 = vmatprep.subr.bf16.mxu1 %v3122_v42  ;;  %v968_v57 = vld [vmem:[#allocation8 + $0x450] sm:$0xff] }
 0x25a   : > { %1490 = vmatprep.mubr.f32.mxu0 %v4104_v59  ;;  %v3134_v41 = vpack.c.bf16 %v969_v55, %v968_v57  ;;  %v1750_v55 = vld [vmem:[#allocation11 + $0x60] sm:$0xff] }
 0x25b   : > { %1346 = vmatmul.mubr.f32.gmra.mrb[36].mxu1 %v4081_v62  ;;  %v970_v62 = vld [vmem:[#allocation8 + $0x460] sm:$0xff] }
 0x25c   : > { %1350 = vmatprep.mubr.f32.mxu1 %v4102_v58  ;;  %3125 = vmatpush3.bf16.msra.mxu1 %v3122_v42 }
 0x25d   : > { %1491 = vmatmul.mubr.f32.gmra.mrb[56].mxu0 %v4085_v2  ;;  %3127 = vmatprep.subr.bf16.mxu1 %v3126_v22  ;;  %v971_v2 = vld [vmem:[#allocation8 + $0x468] sm:$0xff] }
 0x25e   : > { %1495 = vmatprep.mubr.f32.mxu0 %v4114_v12  ;;  %v3138_v42 = vpack.c.bf16 %v971_v2, %v970_v62  ;;  %v1732_v62 = vld [vmem:[#allocation9 + $0x50] sm:$0xff]  ;;  %v1733_v2 = vld [vmem:[#allocation9 + $0x58] sm:$0xff] }
 0x25f   : > { %1351 = vmatmul.mubr.f32.gmra.mrb[38].mxu1 %v4093_v20  ;;  %v972_v20 = vld [vmem:[#allocation8 + $0x470] sm:$0xff] }
 0x260   : > { %1355 = vmatprep.mubr.f32.mxu1 %v4112_v11  ;;  %3129 = vmatpush3.bf16.msra.mxu1 %v3126_v22  ;;  %v3162_v22 = vpack.c.bf16 %v1747_v63, %v1746_v45 }
 0x261   : > { %1496 = vmatmul.mubr.f32.gmra.mrb[58].mxu0 %v4096_v21  ;;  %3131 = vmatprep.subr.bf16.mxu1 %v3130_v53  ;;  %v973_v21 = vld [vmem:[#allocation8 + $0x478] sm:$0xff] }
 0x262   : > { %1500 = vmatprep.mubr.f32.mxu0 %v4124_v48 }
 0x263   : > { %1356 = vmatmul.mubr.f32.gmra.mrb[40].mxu1 %v4104_v59  ;;  %v3142_v59 = vpack.c.bf16 %v973_v21, %v972_v20  ;;  %v4297_v20 = vpack.c.bf16 %v1733_v2, %v1732_v62  ;;  %v1752_v21 = vld [vmem:[#allocation11 + $0x70] sm:$0xff] }
 0x264   : > { %1360 = vmatprep.mubr.f32.mxu1 %v4122_v47  ;;  %3133 = vmatpush3.bf16.msra.mxu1 %v3130_v53  ;;  %v1749_v53 = vld [vmem:[#allocation11 + $0x58] sm:$0xff] }
 0x265   : > { %1501 = vmatmul.mubr.f32.gmra.mrb[60].mxu0 %v4106_v60  ;;  %3135 = vmatprep.subr.bf16.mxu1 %v3134_v41  ;;  %v810_v60 = vld [vmem:[#allocation2 + $0xc1] sm:$0xff]  ;;  %v3166_v57 = vpack.c.bf16 %v1749_v53, %v1748_v61 }
 0x266   : > { %1505 = vmatprep.mubr.f32.mxu0 %v4136_v1 }
 0x267   : > { %1361 = vmatmul.mubr.f32.gmra.mrb[42].mxu1 %v4114_v12  ;;  %v811_v12 = vld [vmem:[#allocation2 + $0xc9] sm:$0xff] }
 0x268   : > { %1365 = vmatprep.mubr.f32.mxu1 %v4134_v0  ;;  %3137 = vmatpush3.bf16.msra.mxu1 %v3134_v41  ;;  %v1751_v41 = vld [vmem:[#allocation11 + $0x68] sm:$0xff] }
 0x269   : > { %1506 = vmatmul.mubr.f32.gmra.mrb[62].mxu0 %v4116_v13  ;;  %3139 = vmatprep.subr.bf16.mxu1 %v3138_v42  ;;  %v779_v13 = vld [vmem:[#allocation2 + $0xc2] sm:$0xff] }
 0x26a   : > { %1510 = vmatprep.mubr.f32.mxu0 %v4147_v5 }
 0x26b   : > { %1366 = vmatmul.mubr.f32.gmra.mrb[44].mxu1 %v4124_v48  ;;  %v812_v48 = vld [vmem:[#allocation2 + $0xd9] sm:$0xff] }
 0x26c   : > { %1370 = vmatprep.mubr.f32.mxu1 %v4145_v50  ;;  %3141 = vmatpush3.bf16.msra.mxu1 %v3138_v42  ;;  %v3170_v42 = vpack.c.bf16 %v1751_v41, %v1750_v55 }
 0x26d   : > { %1511 = vmatmul.mubr.f32.gmra.mrb[64].mxu0 %v4126_v51  ;;  %3143 = vmatprep.subr.bf16.mxu1 %v3142_v59  ;;  %v796_v51 = vld [vmem:[#allocation2 + $0xd8] sm:$0xff] }
 0x26e   : > { %1515 = vmatprep.mubr.f32.mxu0 %v4157_v8 }
 0x26f   : > { %1371 = vmatmul.mubr.f32.gmra.mrb[46].mxu1 %v4136_v1  ;;  %v780_v1 = vld [vmem:[#allocation2 + $0xca] sm:$0xff] }
 0x270   : > { %1375 = vmatprep.mubr.f32.mxu1 %v4155_v7  ;;  %3145 = vmatpush3.bf16.msra.mxu1 %v3142_v59  ;;  %v1753_v59 = vld [vmem:[#allocation11 + $0x78] sm:$0xff] }
 0x271   : > { %1516 = vmatmul.mubr.f32.gmra.mrb[66].mxu0 %v4138_v3  ;;  %v813_v3 = vld [vmem:[#allocation2 + $0xe1] sm:$0xff] }
 0x272   : > { %1520 = vmatprep.mubr.f32.mxu0 %v4167_v15 }
 0x273   : > { %1376 = vmatmul.mubr.f32.gmra.mrb[48].mxu1 %v4147_v5  ;;  %v797_v5 = vld [vmem:[#allocation2 + $0xe0] sm:$0xff] }
 0x274   : > { %1380 = vmatprep.mubr.f32.mxu1 %v4165_v14 }
 0x275   : > { %1521 = vmatmul.mubr.f32.gmra.mrb[68].mxu0 %v4149_v6  ;;  %v1725_v6 = vld [vmem:[#allocation9 + $0x18] sm:$0xff] }
 0x276   : > { %1525 = vmatprep.mubr.f32.mxu0 %v4177_v18 }
 0x277   : > { %1381 = vmatmul.mubr.f32.gmra.mrb[50].mxu1 %v4157_v8  ;;  %v1738_v8 = vld [vmem:[#allocation11] sm:$0xff] }
 0x278   : > { %1385 = vmatprep.mubr.f32.mxu1 %v4175_v17 }
 0x279   : > { %1526 = vmatmul.mubr.f32.gmra.mrb[70].mxu0 %v4159_v10  ;;  %v1739_v10 = vld [vmem:[#allocation11 + $0x8] sm:$0xff] }
 0x27a   : > { %1530 = vmatprep.mubr.f32.mxu0 %v4187_v24 }
 0x27b   : > { %1386 = vmatmul.mubr.f32.gmra.mrb[52].mxu1 %v4167_v15  ;;  %v3146_v15 = vpack.c.bf16 %v1739_v10, %v1738_v8 }
 0x27c   : > { %1390 = vmatprep.mubr.f32.mxu1 %v4185_v9 }
 0x27d   : > { %1531 = vmatmul.mubr.f32.gmra.mrb[72].mxu0 %v4169_v16  ;;  %3147 = vmatprep.subr.bf16.mxu1 %v3146_v15 }
 0x27e   : > { %1535 = vmatprep.mubr.f32.mxu0 %v4197_v44 }
 0x27f   : > { %1391 = vmatmul.mubr.f32.gmra.mrb[54].mxu1 %v4177_v18  ;;  %v1741_v18 = vld [vmem:[#allocation11 + $0x18] sm:$0xff] }
 0x280   : > { %1395 = vmatprep.mubr.f32.mxu1 %v4195_v43 }
 0x281   : > { %1536 = vmatmul.mubr.f32.gmra.mrb[74].mxu0 %v4179_v23 }
 0x282   : > { %1540 = vmatprep.mubr.f32.mxu0 %v810_v60 }
 0x283   : > { %1396 = vmatmul.mubr.f32.gmra.mrb[56].mxu1 %v4187_v24  ;;  %v1743_v24 = vld [vmem:[#allocation11 + $0x28] sm:$0xff] }
 0x284   : > { %1400 = vmatprep.mubr.f32.mxu1 %v4205_v49 }
 0x285   : > { %1541 = vmatmul.mubr.f32.gmra.mrb[76].mxu0 %v4189_v26  ;;  %v1728_v26 = vld [vmem:[#allocation9 + $0x30] sm:$0xff] }
 0x286   : > { %1545 = vmatprep.mubr.f32.mxu0 %v811_v12 }
 0x287   : > { %1401 = vmatmul.mubr.f32.gmra.mrb[58].mxu1 %v4197_v44 }
 0x288   : > { %1405 = vmatprep.mubr.f32.mxu1 %v779_v13 }
 0x289   : > { %1546 = vmatmul.mubr.f32.gmra.mrb[78].mxu0 %v4199_v46 }
 0x28a   : > { %1550 = vmatprep.mubr.f32.mxu0 %v812_v48 }
 0x28b   : > { %1406 = vmatmul.mubr.f32.gmra.mrb[60].mxu1 %v810_v60  ;;  %v3174_v60 = vpack.c.bf16 %v1753_v59, %v1752_v21  ;;  %v4608_v59 = vld [vmem:[#allocation22_spill] sm:$0xff] }
 0x28c   : > { %1410 = vmatprep.mubr.f32.mxu1 %v780_v1 }
 0x28d   : > { %1551 = vmatmul.mubr.f32.gmra.mrb[80].mxu0 %v796_v51 }
 0x28e   : > { %1555 = vmatprep.mubr.f32.mxu0 %v813_v3  ;;  %v1737_v3 = vld [vmem:[#allocation9 + $0x78] sm:$0xff] }
 0x28f   : > { %1411 = vmatmul.mubr.f32.gmra.mrb[62].mxu1 %v811_v12  ;;  %v1734_v12 = vld [vmem:[#allocation9 + $0x60] sm:$0xff] }
 0x290   : > { %2818 = vmatprep.mubr.f32.mxu1 %v4091_v19  ;;  %v828_v19 = vld [vmem:[#allocation2 + $0xda] sm:$0xff] }
 0x291   : > { %1556 = vmatmul.mubr.f32.gmra.mrb[82].mxu0 %v797_v5  ;;  %v4312_v5 = vld [vmem:[%s4606_s5] ss:$0 sm:$0xff]  ;;  %s3632_s5 = smov [#allocation12]  }
 0x292   : > { %s3518_s20 = sshll.u32 %s3632_s5, 4  ;;  %s3519_s20 = int_to_ptr.vmem [resolvable:$false] %s3518_s20 }
 0x293   : > { %2819 = vmatmul.mubr.f32.vlgmr.msra.gmra.mrb[64].mxu1 %v4102_v58  ;;  %v829_v58 = vld [vmem:[#allocation2 + $0xe2] sm:$0xff]  ;;  %s3520_s25 = scalar_lea.vmem %s3519_s20, 4096  ;;  %p3521_p11 = scmp.lt.s32.totalorder %s4496_s19, %s3519_s20 }
 0x294   : > { %2821 = vmatprep.mubr.f32.mxu1 %v4112_v11  ;;  %v1722_v11 = vld [vmem:[#allocation9] sm:$0xff]  ;;  %3149 = vmatpush3.bf16.msra.mxu1 %v3146_v15  ;;  %p3522_p1 = scmp.lt.s32.totalorder %s3520_s25, %s3514_s1 }
 0x296   : > { %p3523_p12 = por %p3522_p1, %p3521_p11 }
 0x297   : > { %2822 = vmatmul.mubr.f32.gmra.mrb[66].mxu1 %v4122_v47  ;;  %v1723_v47 = vld [vmem:[#allocation9 + $0x8] sm:$0xff] }
 0x298   : > { %2824 = vmatprep.mubr.f32.mxu1 %v4134_v0  ;;  %v4277_v0 = vpack.c.bf16 %v1723_v47, %v1722_v11  ;;  %p3524_p2 = pnand %p3523_p12, %p3517_p7 }
 0x29a   : > { %3179 = vmatprep.subr.bf16.mxu0 %v4277_v0 }
 0x29b   : > { %2825 = vmatmul.mubr.f32.gmra.mrb[68].mxu1 %v4145_v50  ;;  %3181 = vmatpush3.bf16.msra.mxu0 %v4277_v0  ;;  %v1724_v50 = vld [vmem:[#allocation9 + $0x10] sm:$0xff] }
 0x29c   : > { %2827 = vmatprep.mubr.f32.mxu1 %v4155_v7  ;;  %v4281_v7 = vpack.c.bf16 %v1725_v6, %v1724_v50 }
 0x29e   : > { %3183 = vmatprep.subr.bf16.mxu0 %v4281_v7 }
 0x29f   : > { %2828 = vmatmul.mubr.f32.gmra.mrb[70].mxu1 %v4165_v14  ;;  %3185 = vmatpush3.bf16.msra.mxu0 %v4281_v7  ;;  %v1726_v14 = vld [vmem:[#allocation9 + $0x20] sm:$0xff] }
 0x2a0   : > { %2830 = vmatprep.mubr.f32.mxu1 %v4175_v17  ;;  %v1740_v17 = vld [vmem:[#allocation11 + $0x10] sm:$0xff] }
 0x2a1   : > { %v3150_v23 = vpack.c.bf16 %v1741_v18, %v1740_v17 }
 0x2a3   : > { %2831 = vmatmul.mubr.f32.gmra.mrb[72].mxu1 %v4185_v9  ;;  %3151 = vmatprep.subr.bf16.mxu1 %v3150_v23  ;;  %v1742_v9 = vld [vmem:[#allocation11 + $0x20] sm:$0xff] }
 0x2a4   : > { %2833 = vmatprep.mubr.f32.mxu1 %v4195_v43  ;;  %3153 = vmatpush3.bf16.msra.mxu1 %v3150_v23  ;;  %v1729_v43 = vld [vmem:[#allocation9 + $0x38] sm:$0xff]  ;;  %v3154_v44 = vpack.c.bf16 %v1743_v24, %v1742_v9 }
 0x2a5   : > { %v4289_v46 = vpack.c.bf16 %v1729_v43, %v1728_v26 }
 0x2a6   : > { %3155 = vmatprep.subr.bf16.mxu1 %v3154_v44 }
 0x2a7   : > { %2834 = vmatmul.mubr.f32.gmra.mrb[74].mxu1 %v4205_v49  ;;  %v1744_v49 = vld [vmem:[#allocation11 + $0x30] sm:$0xff] }
 0x2a8   : > { %2836 = vmatprep.mubr.f32.mxu1 %v779_v13  ;;  %3157 = vmatpush3.bf16.msra.mxu1 %v3154_v44  ;;  %v3158_v56 = vpack.c.bf16 %v1745_v54, %v1744_v49  ;;  %v1735_v13 = vld [vmem:[#allocation9 + $0x68] sm:$0xff] }
 0x2a9   : > { %v4302_v48 = vpack.c.bf16 %v1735_v13, %v1734_v12 }
 0x2aa   : > { %3159 = vmatprep.subr.bf16.mxu1 %v3158_v56 }
 0x2ab   : > { %2837 = vmatmul.mubr.f32.gmra.mrb[76].mxu1 %v780_v1  ;;  %v1736_v1 = vld [vmem:[#allocation9 + $0x70] sm:$0xff] }
 0x2ac   : > { %2839 = vmatprep.mubr.f32.mxu1 %v828_v19  ;;  %3161 = vmatpush3.bf16.msra.mxu1 %v3158_v56  ;;  %v4314_v11 = vpack.c.bf16 %v1737_v3, %v1736_v1 }
 0x2ad   : > { %3163 = vmatprep.subr.bf16.mxu1 %v3162_v22 }
 0x2af   : > { %2840 = vmatmul.mubr.f32.gmra.mrb[78].mxu1 %v829_v58 }
 0x2b0   : > { %2874 = vmatprep.mubr.f32.mxu1 %v3964_v27  ;;  %v1727_v27 = vld [vmem:[#allocation9 + $0x28] sm:$0xff]  ;;  %3165 = vmatpush3.bf16.msra.mxu1 %v3162_v22 }
 0x2b1   : > { %v4285_v16 = vpack.c.bf16 %v1727_v27, %v1726_v14  ;;  %3167 = vmatprep.subr.bf16.mxu1 %v3166_v57 }
 0x2b3   : > { %3187 = vmatprep.subr.bf16.mxu0 %v4285_v16 }
 0x2b4   : > { %3189 = vmatpush3.bf16.msra.mxu0 %v4285_v16  ;;  %3169 = vmatpush3.bf16.msra.mxu1 %v3166_v57 }
 0x2b5   : > { %3191 = vmatprep.subr.bf16.mxu0 %v4289_v46  ;;  %3171 = vmatprep.subr.bf16.mxu1 %v3170_v42 }
 0x2b8   : > { %3193 = vmatpush3.bf16.msra.mxu0 %v4289_v46  ;;  %3173 = vmatpush3.bf16.msra.mxu1 %v3170_v42 }
 0x2b9   : > { %3195 = vmatprep.subr.bf16.mxu0 %v4293_v25  ;;  %3175 = vmatprep.subr.bf16.mxu1 %v3174_v60 }
 0x2bc   : > { %3197 = vmatpush3.bf16.msra.mxu0 %v4293_v25  ;;  %3177 = vmatpush3.bf16.msra.mxu1 %v3174_v60 }
 0x2bd   : > { %3199 = vmatprep.subr.bf16.mxu0 %v4297_v20  ;;  %3210 = vmatprep.subr.bf16.mxu1 %v4277_v0 }
 0x2bf   : > { %2875 = vmatmul.mubr.f32.vlgmr.msra.gmra.mrb[80].mxu1 %v3968_v28 }
 0x2c0   : > { %3201 = vmatpush3.bf16.msra.mxu0 %v4297_v20  ;;  %3218 = vmatpush3.bf16.msra.mxu1 %v4277_v0 }
 0x2c1   : > { %3203 = vmatprep.subr.bf16.mxu0 %v4302_v48  ;;  %2877 = vmatprep.mubr.f32.mxu1 %v3971_v29 }
 0x2c2   : > { %3211 = vmatprep.subr.bf16.mxu1 %v4281_v7 }
 0x2c3   : > { %2878 = vmatmul.mubr.f32.gmra.mrb[82].mxu1 %v3976_v30 }
 0x2c4   : > { %3205 = vmatpush3.bf16.msra.mxu0 %v4302_v48  ;;  %3219 = vmatpush3.bf16.msra.mxu1 %v4281_v7 }
 0x2c5   : > { %3207 = vmatprep.subr.bf16.mxu0 %v4314_v11  ;;  %2880 = vmatprep.mubr.f32.mxu1 %v3979_v31 }
 0x2c6   : > { %3212 = vmatprep.subr.bf16.mxu1 %v4285_v16 }
 0x2c7   : > { %2881 = vmatmul.mubr.f32.gmra.mrb[84].mxu1 %v3984_v32 }
 0x2c8   : > { %3209 = vmatpush3.bf16.msra.mxu0 %v4314_v11  ;;  %3220 = vmatpush3.bf16.msra.mxu1 %v4285_v16 }
 0x2c9   : > { %2883 = vmatprep.mubr.f32.mxu1 %v3987_v33  ;;  %3213 = vmatprep.subr.bf16.mxu1 %v4289_v46 }
 0x2cb   : > { %2884 = vmatmul.mubr.f32.gmra.mrb[86].mxu1 %v3992_v34 }
 0x2cc   : > { %2886 = vmatprep.mubr.f32.mxu1 %v3995_v35  ;;  %3221 = vmatpush3.bf16.msra.mxu1 %v4289_v46 }
 0x2cd   : > { %3214 = vmatprep.subr.bf16.mxu1 %v4293_v25 }
 0x2cf   : > { %2887 = vmatmul.mubr.f32.gmra.mrb[88].mxu1 %v4000_v36 }
 0x2d0   : > { %2889 = vmatprep.mubr.f32.mxu1 %v4003_v37  ;;  %3222 = vmatpush3.bf16.msra.mxu1 %v4293_v25 }
 0x2d1   : > { %3215 = vmatprep.subr.bf16.mxu1 %v4297_v20 }
 0x2d3   : > { %2890 = vmatmul.mubr.f32.gmra.mrb[90].mxu1 %v4008_v38  ;;  %v4607_v38 = vld [vmem:[#allocation21_spill] sm:$0xff] }
 0x2d4   : > { %2892 = vmatprep.mubr.f32.mxu1 %v4011_v39  ;;  %3223 = vmatpush3.bf16.msra.mxu1 %v4297_v20 }
 0x2d5   : > { %3216 = vmatprep.subr.bf16.mxu1 %v4302_v48 }
 0x2d7   : > { %2893 = vmatmul.mubr.f32.gmra.mrb[92].mxu1 %v4016_v40 }
 0x2d8   : > { %2895 = vmatprep.mubr.f32.mxu1 %v4607_v38  ;;  %3224 = vmatpush3.bf16.msra.mxu1 %v4302_v48 }
 0x2d9   : > { %3217 = vmatprep.subr.bf16.mxu1 %v4314_v11 }
 0x2db   : > { %2896 = vmatmul.mubr.f32.gmra.mrb[94].mxu1 %v4608_v59 }
 0x2dc   : > { %3225 = vmatpush3.bf16.msra.mxu1 %v4314_v11 }
 0x2e6   : > { %v2340_v51 = vpop.f32.mrb[0].mxu1 }
 0x2e7   : > { %v2341_v19 = vpop.f32.mrb[1].mxu1 }
 0x2e8   : > { %v2420_v58 = vpop.f32.mrb[20].mxu0  ;;  %v2342_v28 = vadd.f32 %v2341_v19, %v2340_v51 }
 0x2e9   : > { %v2421_v47 = vpop.f32.mrb[21].mxu0 }
 0x2ea   : > { %v2422_v0 = vadd.f32 %v2421_v47, %v2420_v58  ;;  %v1048_v29 = vadd.f32 %v2342_v28, %v4312_v5  ;;  %v2343_v50 = vpop.f32.mrb[2].mxu1 }
 0x2eb   : > { %v2344_v6 = vpop.f32.mrb[3].mxu1 }
 0x2ec   : > { %v2423_v8 = vpop.f32.mrb[22].mxu0  ;;  %v4324_v10 = vadd.f32 %v2422_v0, %v1048_v29  ;;  %v2345_v14 = vadd.f32 %v2344_v6, %v2343_v50 }
 0x2ed   : > { %v2424_v30 = vpop.f32.mrb[23].mxu0 }
 0x2ee   : > { %v2425_v27 = vadd.f32 %v2424_v30, %v2423_v8  ;;  %v1053_v7 = vadd.f32 %v2345_v14, %v4312_v5  ;;  %v2346_v15 = vpop.f32.mrb[4].mxu1 }
 0x2ef   : > { %v2347_v31 = vpop.f32.mrb[5].mxu1 }
 0x2f0   : > { %v2426_v17 = vpop.f32.mrb[24].mxu0  ;;  %v4331_v18 = vadd.f32 %v2425_v27, %v1053_v7  ;;  %v2348_v23 = vadd.f32 %v2347_v31, %v2346_v15 }
 0x2f1   : > { %v2427_v9 = vpop.f32.mrb[25].mxu0 }
 0x2f2   : > { %v2428_v24 = vadd.f32 %v2427_v9, %v2426_v17  ;;  %v1058_v32 = vadd.f32 %v2348_v23, %v4312_v5  ;;  %v2349_v33 = vpop.f32.mrb[6].mxu1 }
 0x2f3   : > { %v2350_v16 = vpop.f32.mrb[7].mxu1 }
 0x2f4   : > { %v2429_v26 = vpop.f32.mrb[26].mxu0  ;;  %v4338_v43 = vadd.f32 %v2428_v24, %v1058_v32  ;;  %v2351_v44 = vadd.f32 %v2350_v16, %v2349_v33 }
 0x2f5   : > { %v2430_v49 = vpop.f32.mrb[27].mxu0 }
 0x2f6   : > { %v2431_v54 = vadd.f32 %v2430_v49, %v2429_v26  ;;  %v1063_v34 = vadd.f32 %v2351_v44, %v4312_v5  ;;  %v2352_v35 = vpop.f32.mrb[8].mxu1 }
 0x2f7   : > { %v2353_v46 = vpop.f32.mrb[9].mxu1 }
 0x2f8   : > { %v2432_v56 = vpop.f32.mrb[28].mxu0  ;;  %v4345_v45 = vadd.f32 %v2431_v54, %v1063_v34  ;;  %v2354_v63 = vadd.f32 %v2353_v46, %v2352_v35 }
 0x2f9   : > { %v2433_v4 = vpop.f32.mrb[29].mxu0 }
 0x2fa   : > { %v2434_v52 = vadd.f32 %v2433_v4, %v2432_v56  ;;  %v1068_v36 = vadd.f32 %v2354_v63, %v4312_v5  ;;  %v2355_v37 = vpop.f32.mrb[10].mxu1 }
 0x2fb   : > { %v2356_v22 = vpop.f32.mrb[11].mxu1 }
 0x2fc   : > { %v2435_v25 = vpop.f32.mrb[30].mxu0  ;;  %v4352_v61 = vadd.f32 %v2434_v52, %v1068_v36  ;;  %v2357_v53 = vadd.f32 %v2356_v22, %v2355_v37 }
 0x2fd   : > { %v2436_v57 = vpop.f32.mrb[31].mxu0 }
 0x2fe   : > { %v2437_v55 = vadd.f32 %v2436_v57, %v2435_v25  ;;  %v1073_v39 = vadd.f32 %v2357_v53, %v4312_v5  ;;  %v2358_v41 = vpop.f32.mrb[12].mxu1 }
 0x2ff   : > { %v2359_v62 = vpop.f32.mrb[13].mxu1 }
 0x300   : > { %v2438_v2 = vpop.f32.mrb[32].mxu0  ;;  %v4359_v42 = vadd.f32 %v2437_v55, %v1073_v39  ;;  %v2360_v20 = vadd.f32 %v2359_v62, %v2358_v41 }
 0x301   : > { %v2439_v21 = vpop.f32.mrb[33].mxu0 }
 0x302   : > { %v2440_v60 = vadd.f32 %v2439_v21, %v2438_v2  ;;  %v1078_v40 = vadd.f32 %v2360_v20, %v4312_v5  ;;  %v2361_v12 = vpop.f32.mrb[14].mxu1 }
 0x303   : > { %v2362_v13 = vpop.f32.mrb[15].mxu1 }
 0x304   : > { %v2441_v48 = vpop.f32.mrb[34].mxu0  ;;  %v4364_v51 = vadd.f32 %v2440_v60, %v1078_v40  ;;  %v2363_v1 = vadd.f32 %v2362_v13, %v2361_v12 }
 0x305   : > { %v2442_v3 = vpop.f32.mrb[35].mxu0 }
 0x306   : > { %v2443_v19 = vadd.f32 %v2442_v3, %v2441_v48  ;;  %v1083_v58 = vadd.f32 %v2363_v1, %v4312_v5  ;;  %v2364_v28 = vpop.f32.mrb[16].mxu1 }
 0x307   : > { %v2365_v47 = vpop.f32.mrb[17].mxu1 }
 0x308   : > { %v2444_v0 = vpop.f32.mrb[36].mxu0  ;;  %v4367_v29 = vadd.f32 %v2443_v19, %v1083_v58  ;;  %v2366_v50 = vadd.f32 %v2365_v47, %v2364_v28 }
 0x309   : > { %v2445_v6 = vpop.f32.mrb[37].mxu0 }
 0x30a   : > { %v2446_v11 = vadd.f32 %v2445_v6, %v2444_v0  ;;  %v1088_v8 = vadd.f32 %v2366_v50, %v4312_v5  ;;  %v2367_v14 = vpop.f32.mrb[18].mxu1 }
 0x30b   : > { %v2368_v30 = vpop.f32.mrb[19].mxu1 }
 0x30c   : > { %v2447_v27 = vpop.f32.mrb[38].mxu0  ;;  %v4370_v7 = vadd.f32 %v2446_v11, %v1088_v8  ;;  %v2369_v15 = vadd.f32 %v2368_v30, %v2367_v14 }
 0x30d   : > { %v2448_v31 = vpop.f32.mrb[39].mxu0 }
 0x30e   : > { %v2449_v17 = vadd.f32 %v2448_v31, %v2447_v27  ;;  %v1093_v23 = vadd.f32 %v2369_v15, %v4312_v5  ;;  %v2370_v9 = vpop.f32.mrb[20].mxu1 }
 0x30f   : > { %v2371_v24 = vpop.f32.mrb[21].mxu1 }
 0x310   : > { %v2450_v32 = vpop.f32.mrb[40].mxu0  ;;  %v4373_v33 = vadd.f32 %v2449_v17, %v1093_v23  ;;  %v2372_v16 = vadd.f32 %v2371_v24, %v2370_v9 }
 0x311   : > { %v2451_v26 = vpop.f32.mrb[41].mxu0 }
 0x312   : > { %v2452_v44 = vadd.f32 %v2451_v26, %v2450_v32  ;;  %v1098_v49 = vadd.f32 %v2372_v16, %v4312_v5  ;;  %v2373_v54 = vpop.f32.mrb[22].mxu1 }
 0x313   : > { %v2374_v34 = vpop.f32.mrb[23].mxu1 }
 0x314   : > { %v2453_v35 = vpop.f32.mrb[42].mxu0  ;;  %v4376_v46 = vadd.f32 %v2452_v44, %v1098_v49  ;;  %v2375_v56 = vadd.f32 %v2374_v34, %v2373_v54 }
 0x315   : > { %v2454_v63 = vpop.f32.mrb[43].mxu0 }
 0x316   : > { %v2455_v4 = vadd.f32 %v2454_v63, %v2453_v35  ;;  %v1103_v52 = vadd.f32 %v2375_v56, %v4312_v5  ;;  %v2376_v36 = vpop.f32.mrb[24].mxu1 }
 0x317   : > { %v2377_v37 = vpop.f32.mrb[25].mxu1 }
 0x318   : > { %v2456_v22 = vpop.f32.mrb[44].mxu0  ;;  %v4379_v25 = vadd.f32 %v2455_v4, %v1103_v52  ;;  %v2378_v53 = vadd.f32 %v2377_v37, %v2376_v36 }
 0x319   : > { %v2457_v57 = vpop.f32.mrb[45].mxu0 }
 0x31a   : > { %v2458_v55 = vadd.f32 %v2457_v57, %v2456_v22  ;;  %v1108_v38 = vadd.f32 %v2378_v53, %v4312_v5  ;;  %v2379_v39 = vpop.f32.mrb[26].mxu1 }
 0x31b   : > { %v2380_v41 = vpop.f32.mrb[27].mxu1 }
 0x31c   : > { %v2459_v62 = vpop.f32.mrb[46].mxu0  ;;  %v4382_v2 = vadd.f32 %v2458_v55, %v1108_v38  ;;  %v2381_v20 = vadd.f32 %v2380_v41, %v2379_v39 }
 0x31d   : > { %v2460_v21 = vpop.f32.mrb[47].mxu0 }
 0x31e   : > { %v2461_v59 = vadd.f32 %v2460_v21, %v2459_v62  ;;  %v1113_v60 = vadd.f32 %v2381_v20, %v4312_v5  ;;  %v2382_v40 = vpop.f32.mrb[28].mxu1 }
 0x31f   : > { %v2383_v12 = vpop.f32.mrb[29].mxu1 }
 0x320   : > { %v2462_v13 = vpop.f32.mrb[48].mxu0  ;;  %v4385_v48 = vadd.f32 %v2461_v59, %v1113_v60  ;;  %v2384_v1 = vadd.f32 %v2383_v12, %v2382_v40 }
 0x321   : > { %v2463_v3 = vpop.f32.mrb[49].mxu0 }
 0x322   : > { %v2464_v19 = vadd.f32 %v2463_v3, %v2462_v13  ;;  %v1118_v58 = vadd.f32 %v2384_v1, %v4312_v5  ;;  %v2385_v28 = vpop.f32.mrb[30].mxu1 }
 0x323   : > { %v2386_v47 = vpop.f32.mrb[31].mxu1 }
 0x324   : > { %v2465_v0 = vpop.f32.mrb[50].mxu0  ;;  %v4388_v50 = vadd.f32 %v2464_v19, %v1118_v58  ;;  %v2387_v6 = vadd.f32 %v2386_v47, %v2385_v28 }
 0x325   : > { %v2466_v11 = vpop.f32.mrb[51].mxu0 }
 0x326   : > { %v2467_v8 = vadd.f32 %v2466_v11, %v2465_v0  ;;  %v1123_v14 = vadd.f32 %v2387_v6, %v4312_v5  ;;  %v2500_v30 = vpop.f32.mrb[32].mxu1 }
 0x327   : > { %v2501_v27 = vpop.f32.mrb[33].mxu1 }
 0x328   : > { %v2580_v15 = vpop.f32.mrb[52].mxu0  ;;  %v4391_v31 = vadd.f32 %v2467_v8, %v1123_v14  ;;  %v2502_v17 = vadd.f32 %v2501_v27, %v2500_v30 }
 0x329   : > { %v2581_v23 = vpop.f32.mrb[53].mxu0 }
 0x32a   : > { %v2582_v9 = vadd.f32 %v2581_v23, %v2580_v15  ;;  %v1338_v24 = vadd.f32 %v2502_v17, %v4324_v10  ;;  %v2503_v32 = vpop.f32.mrb[34].mxu1 }
 0x32b   : > { %v2504_v16 = vpop.f32.mrb[35].mxu1 }
 0x32c   : > { %v2583_v26 = vpop.f32.mrb[54].mxu0  ;;  %v2505_v44 = vadd.f32 %v2504_v16, %v2503_v32  ;;  %v4394_v54 = vadd.f32 %v2582_v9, %v1338_v24 }
 0x32d   : > { %v2584_v49 = vpop.f32.mrb[55].mxu0 }
 0x32e   : > { %v2585_v34 = vadd.f32 %v2584_v49, %v2583_v26  ;;  %v1343_v5 = vadd.f32 %v2505_v44, %v4331_v18  ;;  %v2506_v35 = vpop.f32.mrb[36].mxu1 }
 0x32f   : > { %v2507_v56 = vpop.f32.mrb[37].mxu1 }
 0x330   : > { %v2586_v63 = vpop.f32.mrb[56].mxu0  ;;  %v2508_v4 = vadd.f32 %v2507_v56, %v2506_v35  ;;  %v4397_v36 = vadd.f32 %v2585_v34, %v1343_v5 }
 0x331   : > { %v2587_v52 = vpop.f32.mrb[57].mxu0 }
 0x332   : > { %v2588_v37 = vadd.f32 %v2587_v52, %v2586_v63  ;;  %v1348_v10 = vadd.f32 %v2508_v4, %v4338_v43  ;;  %v2509_v22 = vpop.f32.mrb[38].mxu1 }
 0x333   : > { %v2510_v53 = vpop.f32.mrb[39].mxu1 }
 0x334   : > { %v2589_v57 = vpop.f32.mrb[58].mxu0  ;;  %v2511_v55 = vadd.f32 %v2510_v53, %v2509_v22  ;;  %v4400_v39 = vadd.f32 %v2588_v37, %v1348_v10 }
 0x335   : > { %v2590_v38 = vpop.f32.mrb[59].mxu0 }
 0x336   : > { %v2591_v41 = vadd.f32 %v2590_v38, %v2589_v57  ;;  %v1353_v18 = vadd.f32 %v2511_v55, %v4345_v45  ;;  %v2512_v62 = vpop.f32.mrb[40].mxu1 }
 0x337   : > { %v2513_v20 = vpop.f32.mrb[41].mxu1 }
 0x338   : > { %v2592_v21 = vpop.f32.mrb[60].mxu0  ;;  %v2514_v59 = vadd.f32 %v2513_v20, %v2512_v62  ;;  %v4403_v40 = vadd.f32 %v2591_v41, %v1353_v18 }
 0x339   : > { %v2593_v60 = vpop.f32.mrb[61].mxu0 }
 0x33a   : > { %v2594_v12 = vadd.f32 %v2593_v60, %v2592_v21  ;;  %v1358_v43 = vadd.f32 %v2514_v59, %v4352_v61  ;;  %v2515_v13 = vpop.f32.mrb[42].mxu1 }
 0x33b   : > { %v2516_v1 = vpop.f32.mrb[43].mxu1 }
 0x33c   : > { %v2595_v3 = vpop.f32.mrb[62].mxu0  ;;  %v2517_v19 = vadd.f32 %v2516_v1, %v2515_v13  ;;  %v4406_v28 = vadd.f32 %v2594_v12, %v1358_v43 }
 0x33d   : > { %v2596_v58 = vpop.f32.mrb[63].mxu0 }
 0x33e   : > { %v2597_v47 = vadd.f32 %v2596_v58, %v2595_v3  ;;  %v1363_v45 = vadd.f32 %v2517_v19, %v4359_v42  ;;  %v2518_v0 = vpop.f32.mrb[44].mxu1 }
 0x33f   : > { %v2519_v6 = vpop.f32.mrb[45].mxu1 }
 0x340   : > { %v2598_v11 = vpop.f32.mrb[64].mxu0  ;;  %v2520_v8 = vadd.f32 %v2519_v6, %v2518_v0  ;;  %v4409_v30 = vadd.f32 %v2597_v47, %v1363_v45 }
 0x341   : > { %v2599_v14 = vpop.f32.mrb[65].mxu0 }
 0x342   : > { %v2600_v27 = vadd.f32 %v2599_v14, %v2598_v11  ;;  %v1368_v61 = vadd.f32 %v2520_v8, %v4364_v51  ;;  %v2521_v15 = vpop.f32.mrb[46].mxu1 }
 0x343   : > { %v2522_v17 = vpop.f32.mrb[47].mxu1 }
 0x344   : > { %v2601_v23 = vpop.f32.mrb[66].mxu0  ;;  %v2523_v9 = vadd.f32 %v2522_v17, %v2521_v15  ;;  %v4412_v32 = vadd.f32 %v2600_v27, %v1368_v61 }
 0x345   : > { %v2602_v24 = vpop.f32.mrb[67].mxu0 }
 0x346   : > { %v2603_v16 = vadd.f32 %v2602_v24, %v2601_v23  ;;  %v1373_v42 = vadd.f32 %v2523_v9, %v4367_v29  ;;  %v2524_v26 = vpop.f32.mrb[48].mxu1 }
 0x347   : > { %v2525_v44 = vpop.f32.mrb[49].mxu1 }
 0x348   : > { %v2604_v49 = vpop.f32.mrb[68].mxu0  ;;  %v2526_v34 = vadd.f32 %v2525_v44, %v2524_v26  ;;  %v4415_v35 = vadd.f32 %v2603_v16, %v1373_v42 }
 0x349   : > { %v2605_v5 = vpop.f32.mrb[69].mxu0 }
 0x34a   : > { %v2606_v56 = vadd.f32 %v2605_v5, %v2604_v49  ;;  %v1378_v51 = vadd.f32 %v2526_v34, %v4370_v7  ;;  %v2527_v63 = vpop.f32.mrb[50].mxu1 }
 0x34b   : > { %v2528_v4 = vpop.f32.mrb[51].mxu1 }
 0x34c   : > { %v2607_v52 = vpop.f32.mrb[70].mxu0  ;;  %v2529_v37 = vadd.f32 %v2528_v4, %v2527_v63  ;;  %v4418_v22 = vadd.f32 %v2606_v56, %v1378_v51 }
 0x34d   : > { %v2608_v10 = vpop.f32.mrb[71].mxu0 }
 0x34e   : > { %v2609_v53 = vadd.f32 %v2608_v10, %v2607_v52  ;;  %v1383_v29 = vadd.f32 %v2529_v37, %v4373_v33  ;;  %v2530_v57 = vpop.f32.mrb[52].mxu1 }
 0x34f   : > { %v2531_v55 = vpop.f32.mrb[53].mxu1 }
 0x350   : > { %v2610_v38 = vpop.f32.mrb[72].mxu0  ;;  %v2532_v41 = vadd.f32 %v2531_v55, %v2530_v57  ;;  %v4421_v62 = vadd.f32 %v2609_v53, %v1383_v29 }
 0x351   : > { %v2611_v18 = vpop.f32.mrb[73].mxu0 }
 0x352   : > { %v2612_v20 = vadd.f32 %v2611_v18, %v2610_v38  ;;  %v1388_v7 = vadd.f32 %v2532_v41, %v4376_v46  ;;  %v2533_v21 = vpop.f32.mrb[54].mxu1 }
 0x353   : > { %v2534_v59 = vpop.f32.mrb[55].mxu1 }
 0x354   : > { %v2613_v60 = vpop.f32.mrb[74].mxu0  ;;  %v2535_v12 = vadd.f32 %v2534_v59, %v2533_v21  ;;  %v4424_v13 = vadd.f32 %v2612_v20, %v1388_v7 }
 0x355   : > { %v2614_v43 = vpop.f32.mrb[75].mxu0 }
 0x356   : > { %v2615_v1 = vadd.f32 %v2614_v43, %v2613_v60  ;;  %v1393_v33 = vadd.f32 %v2535_v12, %v4379_v25  ;;  %v2536_v3 = vpop.f32.mrb[56].mxu1 }
 0x357   : > { %v2537_v19 = vpop.f32.mrb[57].mxu1 }
 0x358   : > { %v2616_v58 = vpop.f32.mrb[76].mxu0  ;;  %v2538_v47 = vadd.f32 %v2537_v19, %v2536_v3  ;;  %v4427_v0 = vadd.f32 %v2615_v1, %v1393_v33 }
 0x359   : > { %v2617_v45 = vpop.f32.mrb[77].mxu0 }
 0x35a   : > { %v2618_v6 = vadd.f32 %v2617_v45, %v2616_v58  ;;  %v1398_v46 = vadd.f32 %v2538_v47, %v4382_v2  ;;  %v2539_v11 = vpop.f32.mrb[58].mxu1 }
 0x35b   : > { %v2540_v8 = vpop.f32.mrb[59].mxu1 }
 0x35c   : > { %v2619_v14 = vpop.f32.mrb[78].mxu0  ;;  %v2541_v27 = vadd.f32 %v2540_v8, %v2539_v11  ;;  %v4430_v15 = vadd.f32 %v2618_v6, %v1398_v46 }
 0x35d   : > { %v2620_v61 = vpop.f32.mrb[79].mxu0 }
 0x35e   : > { %v2621_v17 = vadd.f32 %v2620_v61, %v2619_v14  ;;  %v1403_v25 = vadd.f32 %v2541_v27, %v4385_v48  ;;  %v2542_v23 = vpop.f32.mrb[60].mxu1 }
 0x35f   : > { %v2543_v9 = vpop.f32.mrb[61].mxu1 }
 0x360   : > { %v2622_v24 = vpop.f32.mrb[80].mxu0  ;;  %v2544_v16 = vadd.f32 %v2543_v9, %v2542_v23  ;;  %v1548_v26 = vadd.f32 %v2621_v17, %v1403_v25 }
 0x361   : > { %v2623_v42 = vpop.f32.mrb[81].mxu0 }
 0x362   : > { %v2624_v44 = vadd.f32 %v2623_v42, %v2622_v24  ;;  %v1408_v49 = vadd.f32 %v2544_v16, %v4388_v50  ;;  %v2545_v2 = vpop.f32.mrb[62].mxu1 }
 0x363   : > { %v2546_v34 = vpop.f32.mrb[63].mxu1 }
 0x364   : > { %v2625_v5 = vpop.f32.mrb[82].mxu0  ;;  %v2547_v56 = vadd.f32 %v2546_v34, %v2545_v2  ;;  %v1553_v63 = vadd.f32 %v2624_v44, %v1408_v49 }
 0x365   : > { %v2626_v51 = vpop.f32.mrb[83].mxu0 }
 0x366   : > { %v2627_v4 = vadd.f32 %v2626_v51, %v2625_v5  ;;  %v1413_v52 = vadd.f32 %v2547_v56, %v4391_v31  ;;  %v2820_v37 = vpop.f32.mrb[64].mxu1 }
 0x367   : > { %v1633_v48 = vadd.f32 %v2820_v37, %v4397_v36  ;;  %v1627_v10 = vpop.f32.mrb[65].mxu1  ;;  %v4455_v37 = vld [vmem:[%s4609_s27] ss:$0 sm:$0xff] }
 0x368   : > { %v1628_v53 = vadd.f32 %v1627_v10, %v4394_v54  ;;  %v1558_v29 = vadd.f32 %v2627_v4, %v1413_v52 }
 0x369   : > { %v1707_v38 = vmax.f32 %v1633_v48, 0.0 }
 0x36a   : > { %v1706_v57 = vmax.f32 %v1628_v53, 0.0  ;;  %v2823_v55 = vpop.f32.mrb[66].mxu1 }
 0x36b   : > { %v1643_v50 = vadd.f32 %v2823_v55, %v4403_v40  ;;  %v1637_v41 = vpop.f32.mrb[67].mxu1 }
 0x36c   : > { %v1638_v18 = vadd.f32 %v1637_v41, %v4400_v39  ;;  %2930 = vmatprep.mubr.f32.mxu0 %v1706_v57 }
 0x36d   : > { %2931 = vmatmul.mubr.f32.vlgmr.msra.gmra.mrb[84].mxu0 %v1707_v38  ;;  %v1709_v31 = vmax.f32 %v1643_v50, 0.0 }
 0x36e   : > { %v1708_v20 = vmax.f32 %v1638_v18, 0.0  ;;  %v2826_v7 = vpop.f32.mrb[68].mxu1 }
 0x36f   : > { %v1653_v21 = vadd.f32 %v2826_v7, %v4409_v30  ;;  %v1647_v36 = vpop.f32.mrb[69].mxu1 }
 0x370   : > { %v1648_v59 = vadd.f32 %v1647_v36, %v4406_v28  ;;  %2933 = vmatprep.mubr.f32.mxu0 %v1708_v20 }
 0x371   : > { %2934 = vmatmul.mubr.f32.gmra.mrb[86].mxu0 %v1709_v31  ;;  %v1711_v12 = vmax.f32 %v1653_v21, 0.0 }
 0x372   : > { %v1710_v54 = vmax.f32 %v1648_v59, 0.0  ;;  %v2829_v60 = vpop.f32.mrb[70].mxu1 }
 0x373   : > { %v1663_v40 = vadd.f32 %v2829_v60, %v4415_v35  ;;  %v1657_v43 = vpop.f32.mrb[71].mxu1 }
 0x374   : > { %v1658_v39 = vadd.f32 %v1657_v43, %v4412_v32  ;;  %2936 = vmatprep.mubr.f32.mxu0 %v1710_v54 }
 0x375   : > { %2937 = vmatmul.mubr.f32.gmra.mrb[88].mxu0 %v1711_v12  ;;  %v1713_v3 = vmax.f32 %v1663_v40, 0.0 }
 0x376   : > { %v1712_v1 = vmax.f32 %v1658_v39, 0.0  ;;  %v2832_v33 = vpop.f32.mrb[72].mxu1 }
 0x377   : > { %v1673_v30 = vadd.f32 %v2832_v33, %v4421_v62  ;;  %v1667_v19 = vpop.f32.mrb[73].mxu1 }
 0x378   : > { %v1668_v28 = vadd.f32 %v1667_v19, %v4418_v22  ;;  %2939 = vmatprep.mubr.f32.mxu0 %v1712_v1 }
 0x379   : > { %2940 = vmatmul.mubr.f32.gmra.mrb[90].mxu0 %v1713_v3  ;;  %v1715_v45 = vmax.f32 %v1673_v30, 0.0 }
 0x37a   : > { %v1714_v58 = vmax.f32 %v1668_v28, 0.0  ;;  %v2835_v47 = vpop.f32.mrb[74].mxu1 }
 0x37b   : > { %v1683_v35 = vadd.f32 %v2835_v47, %v4427_v0  ;;  %v1677_v6 = vpop.f32.mrb[75].mxu1 }
 0x37c   : > { %v1678_v32 = vadd.f32 %v1677_v6, %v4424_v13  ;;  %2942 = vmatprep.mubr.f32.mxu0 %v1714_v58 }
 0x37d   : > { %2943 = vmatmul.mubr.f32.gmra.mrb[92].mxu0 %v1715_v45  ;;  %v1717_v8 = vmax.f32 %v1683_v35, 0.0 }
 0x37e   : > { %v1716_v46 = vmax.f32 %v1678_v32, 0.0  ;;  %v2838_v11 = vpop.f32.mrb[76].mxu1 }
 0x37f   : > { %v1693_v14 = vadd.f32 %v2838_v11, %v1548_v26  ;;  %v1687_v62 = vpop.f32.mrb[77].mxu1 }
 0x380   : > { %v1688_v27 = vadd.f32 %v1687_v62, %v4430_v15  ;;  %2945 = vmatprep.mubr.f32.mxu0 %v1716_v46 }
 0x381   : > { %2946 = vmatmul.mubr.f32.gmra.mrb[94].mxu0 %v1717_v8  ;;  %v1719_v17 = vmax.f32 %v1693_v14, 0.0 }
 0x382   : > { %v1718_v22 = vmax.f32 %v1688_v27, 0.0  ;;  %v2841_v61 = vpop.f32.mrb[78].mxu1 }
 0x383   : > { %v1703_v25 = vadd.f32 %v2841_v61, %v1558_v29  ;;  %v1697_v23 = vpop.f32.mrb[79].mxu1 }
 0x384   : > { %v1698_v0 = vadd.f32 %v1697_v23, %v1553_v63  ;;  %2948 = vmatprep.mubr.f32.mxu0 %v1718_v22 }
 0x385   : > { %2949 = vmatmul.mubr.f32.gmra.mrb[96].mxu0 %v1719_v17  ;;  %v1721_v9 = vmax.f32 %v1703_v25, 0.0 }
 0x386   : > { %v1720_v13 = vmax.f32 %v1698_v0, 0.0 }
 0x388   : > { %2951 = vmatprep.mubr.f32.mxu1 %v1720_v13 }
 0x389   : > { %2952 = vmatmul.mubr.f32.vlgmr.msra.gmra.mrb[94].mxu1 %v1721_v9 }
 0x392   : > { %v2876_v24 = vpop.f32.mrb[80].mxu1 }
 0x393   : > { %v1820_v16 = vpop.f32.mrb[81].mxu1 }
 0x396   : > { %v2879_v42 = vpop.f32.mrb[82].mxu1 }
 0x397   : > { %v1830_v26 = vpop.f32.mrb[83].mxu1 }
 0x39a   : > { %v2882_v44 = vpop.f32.mrb[84].mxu1 }
 0x39b   : > { %v1840_v15 = vpop.f32.mrb[85].mxu1 }
 0x39e   : > { %v2885_v49 = vpop.f32.mrb[86].mxu1 }
 0x39f   : > { %v1850_v2 = vpop.f32.mrb[87].mxu1 }
 0x3a2   : > { %v2888_v34 = vpop.f32.mrb[88].mxu1 }
 0x3a3   : > { %v1860_v5 = vpop.f32.mrb[89].mxu1 }
 0x3a6   : > { %v2891_v56 = vpop.f32.mrb[90].mxu1 }
 0x3a7   : > { %v1870_v51 = vpop.f32.mrb[91].mxu1 }
 0x3aa   : > { %v4448_v63 = vpop.f32.mrb[92].mxu1 }
 0x3ab   : > { %v4450_v4 = vpop.f32.mrb[93].mxu1 }
 0x440   : > { %v2932_v52 = vpop.f32.mrb[84].mxu0 }
 0x441   : > { %v1971_v48 = vadd.f32 %v2932_v52, %v2876_v24  ;;  %v1965_v10 = vpop.f32.mrb[85].mxu0 }
 0x442   : > { %v1966_v53 = vadd.f32 %v1965_v10, %v1820_v16 }
 0x443   : > { %v2052_v29 = vadd.f32 %v4455_v37, %v1971_v48 }
 0x444   : > { %v2051_v57 = vadd.f32 %v4455_v37, %v1966_v53  ;;  %v2935_v55 = vpop.f32.mrb[86].mxu0 }
 0x445   : > { %v2068_v38 = vmax.f32 %v2052_v29, 0.0  ;;  %v1981_v50 = vadd.f32 %v2935_v55, %v2879_v42  ;;  %v1975_v41 = vpop.f32.mrb[87].mxu0 }
 0x446   : > { %v2067_v18 = vmax.f32 %v2051_v57, 0.0  ;;  %v1976_v20 = vadd.f32 %v1975_v41, %v1830_v26 }
 0x447   : > { %2084 = vst [vmem:[%s4056_s4 + $0x8] sm:$0xff] %v2068_v38  ;;  %v2054_v7 = vadd.f32 %v4455_v37, %v1981_v50 }
 0x448   : > { %2083 = vst [vmem:[%s4056_s4] sm:$0xff] %v2067_v18  ;;  %v2053_v31 = vadd.f32 %v4455_v37, %v1976_v20  ;;  %v2938_v21 = vpop.f32.mrb[88].mxu0 }
 0x449   : > { %v2070_v36 = vmax.f32 %v2054_v7, 0.0  ;;  %v1991_v59 = vadd.f32 %v2938_v21, %v2882_v44  ;;  %v1985_v54 = vpop.f32.mrb[89].mxu0 }
 0x44a   : > { %v2069_v60 = vmax.f32 %v2053_v31, 0.0  ;;  %v1986_v12 = vadd.f32 %v1985_v54, %v1840_v15 }
 0x44b   : > { %2086 = vst [vmem:[%s4056_s4 + $0x18] sm:$0xff] %v2070_v36  ;;  %v2056_v40 = vadd.f32 %v4455_v37, %v1991_v59 }
 0x44c   : > { %2085 = vst [vmem:[%s4056_s4 + $0x10] sm:$0xff] %v2069_v60  ;;  %v2055_v43 = vadd.f32 %v4455_v37, %v1986_v12  ;;  %v2941_v39 = vpop.f32.mrb[90].mxu0 }
 0x44d   : > { %v2072_v1 = vmax.f32 %v2056_v40, 0.0  ;;  %v2001_v33 = vadd.f32 %v2941_v39, %v2885_v49  ;;  %v1995_v3 = vpop.f32.mrb[91].mxu0 }
 0x44e   : > { %v2071_v30 = vmax.f32 %v2055_v43, 0.0  ;;  %v1996_v19 = vadd.f32 %v1995_v3, %v1850_v2 }
 0x44f   : > { %2088 = vst [vmem:[%s4056_s4 + $0x28] sm:$0xff] %v2072_v1  ;;  %v2058_v28 = vadd.f32 %v4455_v37, %v2001_v33 }
 0x450   : > { %2087 = vst [vmem:[%s4056_s4 + $0x20] sm:$0xff] %v2071_v30  ;;  %v2057_v58 = vadd.f32 %v4455_v37, %v1996_v19  ;;  %v2944_v47 = vpop.f32.mrb[92].mxu0 }
 0x451   : > { %v2074_v45 = vmax.f32 %v2058_v28, 0.0  ;;  %v2011_v35 = vadd.f32 %v2944_v47, %v2888_v34  ;;  %v2005_v6 = vpop.f32.mrb[93].mxu0 }
 0x452   : > { %v2073_v32 = vmax.f32 %v2057_v58, 0.0  ;;  %v2006_v46 = vadd.f32 %v2005_v6, %v1860_v5 }
 0x453   : > { %2090 = vst [vmem:[%s4056_s4 + $0x38] sm:$0xff] %v2074_v45  ;;  %v2060_v11 = vadd.f32 %v4455_v37, %v2011_v35 }
 0x454   : > { %2089 = vst [vmem:[%s4056_s4 + $0x30] sm:$0xff] %v2073_v32  ;;  %v2059_v8 = vadd.f32 %v4455_v37, %v2006_v46  ;;  %v2947_v14 = vpop.f32.mrb[94].mxu0 }
 0x455   : > { %v2076_v62 = vmax.f32 %v2060_v11, 0.0  ;;  %v2021_v27 = vadd.f32 %v2947_v14, %v2891_v56  ;;  %v2015_v22 = vpop.f32.mrb[95].mxu0 }
 0x456   : > { %v2075_v61 = vmax.f32 %v2059_v8, 0.0  ;;  %v2016_v17 = vadd.f32 %v2015_v22, %v1870_v51 }
 0x457   : > { %2092 = vst [vmem:[%s4056_s4 + $0x48] sm:$0xff] %v2076_v62  ;;  %v2062_v25 = vadd.f32 %v4455_v37, %v2021_v27 }
 0x458   : > { %2091 = vst [vmem:[%s4056_s4 + $0x40] sm:$0xff] %v2075_v61  ;;  %v2061_v23 = vadd.f32 %v4455_v37, %v2016_v17  ;;  %v2950_v0 = vpop.f32.mrb[96].mxu0 }
 0x459   : > { %v2078_v13 = vmax.f32 %v2062_v25, 0.0  ;;  %v2031_v9 = vadd.f32 %v2950_v0, %v4448_v63  ;;  %v2025_v24 = vpop.f32.mrb[97].mxu0 }
 0x45a   : > { %v2077_v16 = vmax.f32 %v2061_v23, 0.0  ;;  %v2026_v42 = vadd.f32 %v2025_v24, %v4450_v4 }
 0x45b   : > { %2094 = vst [vmem:[%s4056_s4 + $0x58] sm:$0xff] %v2078_v13  ;;  %v2064_v26 = vadd.f32 %v4455_v37, %v2031_v9 }
 0x45c   : > { %2093 = vst [vmem:[%s4056_s4 + $0x50] sm:$0xff] %v2077_v16  ;;  %v2063_v44 = vadd.f32 %v4455_v37, %v2026_v42  ;;  %v2953_v15 = vpop.f32.mrb[94].mxu1 }
 0x45d   : > { %v2080_v49 = vmax.f32 %v2064_v26, 0.0  ;;  %v2066_v2 = vadd.f32 %v2953_v15, %v4455_v37  ;;  %v2035_v34 = vpop.f32.mrb[95].mxu1 }
 0x45e   : > { %v2079_v5 = vmax.f32 %v2063_v44, 0.0  ;;  %v2065_v56 = vadd.f32 %v4455_v37, %v2035_v34 }
 0x45f   : > { %2096 = vst [vmem:[%s4056_s4 + $0x68] sm:$0xff] %v2080_v49  ;;  %v2082_v51 = vmax.f32 %v2066_v2, 0.0 }
 0x460   : > { %2095 = vst [vmem:[%s4056_s4 + $0x60] sm:$0xff] %v2079_v5  ;;  %v2081_v63 = vmax.f32 %v2065_v56, 0.0 }
 0x461   : > { %2098 = vst [vmem:[%s4056_s4 + $0x78] sm:$0xff] %v2082_v51 }
 0x462   : > { %2097 = vst [vmem:[%s4056_s4 + $0x70] sm:$0xff] %v2081_v63 }
 0x463   : > { %3527 = shalt.err (!%p3524_p2)
}
 0x464   : > { %s3528_s4 = scalar_lea.hbm %s4494_s9, 2048  ;;  %s3532_s26 = scalar_lea.hbm %s4612_s16, 8192 }
 0x465   : > { %p3529_p8 = scmp.ne.s32.totalorder %s4494_s9, %s3528_s4  ;;  %p3533_p9 = scmp.lt.u32.totalorder %s4494_s9, %s4612_s16 }
 0x466   : > { %p3534_p6 = scmp.lt.u32.totalorder %s3532_s26, %s3528_s4  ;;  %p3536_p0 = scmp.lt.u32.totalorder %s3528_s4, %s4494_s9 }
 0x467   : > { %p3530_p13 = pnand %p3529_p8, %p3880_p3 }
 0x468   : > { %p3535_p10 = por %p3534_p6, %p3533_p9 }
 0x469   : > { %p3531_p4 = pneg %p3530_p13 }
 0x46a   : > { %p3537_p5 = por %p3536_p0, %p3535_p10 }
 0x46c   : > { %p3538_p7 = pnand %p3537_p5, %p3531_p4 }
 0x46e   : > { %3541 = shalt.err (!%p3538_p7)
}
 0x46f   : > { %s3633_s7 = smov 128   ;;  %s3634_s3 = smov 8  }
 0x470   : > { %3264 = dma.vmem_to_hbm [thread:$0]  (%p3880_p3), %s4496_s19, 2048, %s4494_s9, %s2100_s14, %s3633_s7, %s3633_s7, %s3634_s3  }
 0x471 PF: > { %s4613_s15 = sld [smem:[#allocation17_spill]]  ;;  %s4614_s17 = sld [smem:[#allocation20_spill]] }
 0x472   : > { %p3296_p11 = scmp.ge.s32.totalorder %s3620_s12, 2 }
 0x477   : > { %s2131_s1 = sand.u32 1, %s4613_s15   ;;  %p4615_p1 = scmp.ne.s32.totalorder %s4614_s17, 0 }
 0x478   : > { %s2132_s5 = scalar_lea.sflag [#allocation5], %s2131_s1 }
 0x479   : > { %p3284_p12 = pnand %p3296_p11, %p4615_p1 }
 0x47b   : > { %3587 = dma.done.wait (!%p3284_p12), %s2132_s5, 2048  }
 0x47c   : > { %3589 = vsyncadd (!%p3284_p12), %s2132_s5, 4294965248  ;;  %s26_s12 = sadd.s32 1, %s3620_s12   ;;  %s4616_s27 = smov %s3596_s28 }
 0x47d   : > { %p23_p2 = scmp.ge.s32.totalorder %s26_s12, 6   ;;  %s4617_s28 = smov %s3600_s29 }
 0x47e   : > { %s4618_s29 = smov %s3899_s18  ;;  %s4619_s30 = smov %s3612_s10 }
 0x47f   : > { %s4620_s9 = smov %s3616_s11  ;;  %s4621_s10 = smov %s4624_s8 }
 0x480   : > { %s4622_s11 = smov %s4628_s22  ;;  %25 = sbr.rel (!%p23_p2) target bundleno = 16 (0x10), region = 124 }
 0x487   :  { %2137 = vsyncpa [#allocation4], 1 }
 0x488   :  { %2139 = vsyncpa [#allocation4 + $0x1], 1 }
 0x489   :  { %2140 = vsyncpa [#allocation7], 1 }
 0x48a   :  { %2141 = vsyncpa [#allocation10], 1 }
 0x48b   :  { %2142 = vsyncpa [#allocation5], 1 }
 0x48c   :  { %2144 = vsyncpa [#allocation5 + $0x1], 1 }

</bundles_post_ra>
